<compile_context>
chip_gen: v7x
topology: tpu7x:2x2x1
jax: 0.10.0
libtpu: 0.0.40
codegen_flags: <defaults>
</compile_context>

<pallas_src>
import functools

import jax
import jax.numpy as jnp
from jax.experimental import pallas as pl
from jax.experimental.pallas import tpu as pltpu


# Explicit scoped-VMEM budget: v7x has only 64 MiB physical / 32 MiB default
# scoped.  With the tile sizes chosen below every kernel stays well under
# ~4 MiB, so a 32 MiB cap is safe on v5e/v6e/v7x alike; re-derive if enlarged.
_VMEM_LIMIT = 32 * 1024 * 1024


# ----------------------------------------------------------------------------
# Kernel 1: fused 1x1-conv QKV projection -> per-head bf16 tensors.
# ----------------------------------------------------------------------------
def _qkv_proj_kernel(x_ref, w_ref, b_ref, q_ref, k_ref, v_ref,
                     *, num_heads, hd_pad):
    x = x_ref[0].astype(jnp.bfloat16)                        # (TS, C)
    # One bf16 MXU matmul for q|k|v together, f32 accumulation, f32 bias add.
    t = jnp.dot(x, w_ref[...], preferred_element_type=jnp.float32)
    t = (t + b_ref[...]).astype(jnp.bfloat16)                # (TS, 3*H*hd_pad)
    dp = num_heads * hd_pad
    for idx, o_ref in enumerate((q_ref, k_ref, v_ref)):
        for h in range(num_heads):                           # 128-aligned slices
            lo = idx * dp + h * hd_pad
            o_ref[0, h] = t[:, lo:lo + hd_pad]


# ----------------------------------------------------------------------------
# Kernel 2: online-softmax flash attention + output projection + residual,
# emitting per-q-tile GroupNorm partial statistics.
# ----------------------------------------------------------------------------
def _flash_attn_kernel(q_ref, k_ref, v_ref, x_ref, wp_ref, bp_ref,
                       r_ref, rsum_ref, rsq_ref,
                       m_sc, l_sc, acc_sc, *, num_heads):
    ki = pl.program_id(2)

    @pl.when(ki == 0)
    def _init():
        m_sc[...] = jnp.full(m_sc.shape, -jnp.inf, dtype=m_sc.dtype)
        l_sc[...] = jnp.zeros(l_sc.shape, dtype=l_sc.dtype)
        acc_sc[...] = jnp.zeros(acc_sc.shape, dtype=acc_sc.dtype)

    q = q_ref[0]                                             # (H, TQ, hdp) bf16
    k = k_ref[0]                                             # (H, TK, hdp) bf16
    v = v_ref[0]                                             # (H, TK, hdp) bf16

    # All heads in one batched MXU call, contracting the last axis of both
    # operands (no materialized k.T, no per-head slicing).
    s = jnp.einsum('hqd,hkd->hqk', q, k,
                   preferred_element_type=jnp.float32)       # (H, TQ, TK) f32

    m_prev = m_sc[...]                                       # (H, TQ, 1) f32
    m_new = jnp.maximum(m_prev, jnp.max(s, axis=-1, keepdims=True))
    alpha = jnp.exp(m_prev - m_new)
    p = jnp.exp(s - m_new)                                   # unnormalized probs
    l_sc[...] = alpha * l_sc[...] + jnp.sum(p, axis=-1, keepdims=True)
    pv = jnp.einsum('hqk,hkd->hqd', p.astype(jnp.bfloat16), v,
                    preferred_element_type=jnp.float32)      # (H, TQ, hdp) f32
    acc_sc[...] = alpha * acc_sc[...] + pv
    m_sc[...] = m_new

    @pl.when(ki == pl.num_programs(2) - 1)
    def _finalize():
        # Deferred softmax normalization on the small accumulator (EUP recip).
        inv_l = pl.reciprocal(l_sc[...], approx=True)
        attn = (acc_sc[...] * inv_l).astype(jnp.bfloat16)    # (H, TQ, hdp)
        # Per-head output projection accumulated over heads (no (H,TQ,C)
        # intermediate, no head concat; zero-padded wp rows make the head_dim
        # padding a no-op).
        y = jnp.dot(attn[0], wp_ref[0], preferred_element_type=jnp.float32)
        for h in range(1, num_heads):
            y = y + jnp.dot(attn[h], wp_ref[h],
                            preferred_element_type=jnp.float32)
        r = x_ref[0] + y + bp_ref[...]                       # residual, f32
        r_ref[0] = r
        # GroupNorm partials for this (batch, q-tile): per-channel sum / sumsq.
        rsum_ref[...] = jnp.sum(r, axis=0, keepdims=True)[None, None]
        rsq_ref[...] = jnp.sum(r * r, axis=0, keepdims=True)[None, None]


# ----------------------------------------------------------------------------
# Kernel 3: apply the precomputed per-channel GroupNorm scale/shift.
# ----------------------------------------------------------------------------
def _gn_apply_kernel(r_ref, scale_ref, shift_ref, o_ref):
    o_ref[0] = r_ref[0] * scale_ref[0] + shift_ref[0]


def _seq_tile(s, preferred=(512, 256, 128)):
    for t in preferred:
        if s % t == 0:
            return t
    return s


def flash_self_attention(x_nchw, params, *, num_heads, head_dim, groups,
                         eps=1e-5):
    B, C, Himg, Wimg = x_nchw.shape
    S = Himg * Wimg
    assert C % groups == 0
    cg = C // groups
    f32, bf16 = jnp.float32, jnp.bfloat16

    # Pad head_dim up to a multiple of 128 lanes (zero padding via the weights:
    # numerically a no-op, but makes every q/k/v/attention block lane-dense).
    hd_pad = ((head_dim + 127) // 128) * 128
    Dp = num_heads * hd_pad
    scale = head_dim ** (-0.5)          # SDPA default scale (original head_dim)

    def pad_qkv_w(w):                   # (C, H*hd) -> (C, H*hd_pad)
        w = w.reshape(C, num_heads, head_dim)
        w = jnp.pad(w, ((0, 0), (0, 0), (0, hd_pad - head_dim)))
        return w.reshape(C, Dp)

    def pad_qkv_b(b):                   # (1, H*hd) -> (1, H*hd_pad)
        b = b.reshape(num_heads, head_dim)
        b = jnp.pad(b, ((0, 0), (0, hd_pad - head_dim)))
        return b.reshape(1, Dp)

    # One-time weight transforms: fold attention scale into W_q/b_q, pad heads,
    # concatenate q|k|v weights for a single fused projection matmul, cast MXU
    # operands to bf16 (biases stay f32 and are added post-accumulate).
    wqkv = jnp.concatenate([pad_qkv_w(params["wq"] * scale),
                            pad_qkv_w(params["wk"]),
                            pad_qkv_w(params["wv"])], axis=1).astype(bf16)
    bqkv = jnp.concatenate([pad_qkv_b(params["bq"] * scale),
                            pad_qkv_b(params["bk"]),
                            pad_qkv_b(params["bv"])], axis=1).astype(f32)
    wp = jnp.pad(params["wp"].reshape(num_heads, head_dim, C),
                 ((0, 0), (0, hd_pad - head_dim), (0, 0))).astype(bf16)  # (H,hdp,C)
    bp = params["bp"].astype(f32)                                         # (1, C)
    gamma = params["gamma"].astype(f32)                                   # (1, C)
    beta = params["beta"].astype(f32)                                     # (1, C)

    # NCHW -> (B, S, C): channels-last so the 1x1 convs are per-pixel matmuls.
    xs = jnp.transpose(x_nchw.reshape(B, C, S), (0, 2, 1)).astype(f32)

    TS = _seq_tile(S)                            # streaming tile (proj / norm)
    TQ = _seq_tile(S, (256, 128))                # attention query tile
    TK = TQ                                      # attention kv tile
    nS, nQ, nK = S // TS, S // TQ, S // TK

    stream_params = pltpu.CompilerParams(
        dimension_semantics=("parallel", "parallel"),
        vmem_limit_bytes=_VMEM_LIMIT)
    attn_params = pltpu.CompilerParams(
        dimension_semantics=("parallel", "parallel", "arbitrary"),
        vmem_limit_bytes=_VMEM_LIMIT)

    # ---------------- Kernel 1: fused QKV projection ---------------------------
    qkv_shape = jax.ShapeDtypeStruct((B, num_heads, S, hd_pad), bf16)
    head_out_spec = pl.BlockSpec((1, num_heads, TS, hd_pad),
                                 lambda b, s: (b, 0, s, 0))
    q, k, v = pl.pallas_call(
        functools.partial(_qkv_proj_kernel, num_heads=num_heads, hd_pad=hd_pad),
        out_shape=(qkv_shape, qkv_shape, qkv_shape),
        grid=(B, nS),
        in_specs=[
            pl.BlockSpec((1, TS, C), lambda b, s: (b, s, 0)),
            pl.BlockSpec((C, 3 * Dp), lambda b, s: (0, 0)),
            pl.BlockSpec((1, 3 * Dp), lambda b, s: (0, 0)),
        ],
        out_specs=(head_out_spec, head_out_spec, head_out_spec),
        compiler_params=stream_params,
    )(xs, wqkv, bqkv)

    # ---------------- Kernel 2: flash attention + proj + residual -------------
    r, rsum, rsq = pl.pallas_call(
        functools.partial(_flash_attn_kernel, num_heads=num_heads),
        out_shape=(
            jax.ShapeDtypeStruct((B, S, C), f32),          # r = x + proj(attn)
            jax.ShapeDtypeStruct((B, nQ, 1, C), f32),      # per-tile sum
            jax.ShapeDtypeStruct((B, nQ, 1, C), f32),      # per-tile sum of sq
        ),
        grid=(B, nQ, nK),
        in_specs=[
            pl.BlockSpec((1, num_heads, TQ, hd_pad), lambda b, i, j: (b, 0, i, 0)),
            pl.BlockSpec((1, num_heads, TK, hd_pad), lambda b, i, j: (b, 0, j, 0)),
            pl.BlockSpec((1, num_heads, TK, hd_pad), lambda b, i, j: (b, 0, j, 0)),
            pl.BlockSpec((1, TQ, C), lambda b, i, j: (b, i, 0)),       # residual x
            pl.BlockSpec((num_heads, hd_pad, C), lambda b, i, j: (0, 0, 0)),  # wp
            pl.BlockSpec((1, C), lambda b, i, j: (0, 0)),              # bp
        ],
        out_specs=(
            pl.BlockSpec((1, TQ, C), lambda b, i, j: (b, i, 0)),
            pl.BlockSpec((1, 1, 1, C), lambda b, i, j: (b, i, 0, 0)),
            pl.BlockSpec((1, 1, 1, C), lambda b, i, j: (b, i, 0, 0)),
        ),
        scratch_shapes=[
            pltpu.VMEM((num_heads, TQ, 1), f32),           # m (running max)
            pltpu.VMEM((num_heads, TQ, 1), f32),           # l (running denom)
            pltpu.VMEM((num_heads, TQ, hd_pad), f32),      # acc (running PV)
        ],
        compiler_params=attn_params,
    )(q, k, v, xs, wp, bp)

    # ---------------- tiny O(B*C) GroupNorm statistics glue -------------------
    sum_c = jnp.sum(rsum[:, :, 0, :], axis=1)              # (B, C)
    sq_c = jnp.sum(rsq[:, :, 0, :], axis=1)                # (B, C)
    n_elem = S * cg
    g_mean = jnp.sum(sum_c.reshape(B, groups, cg), axis=-1) / n_elem     # (B, G)
    g_var = jnp.sum(sq_c.reshape(B, groups, cg), axis=-1) / n_elem - g_mean ** 2
    g_rstd = jax.lax.rsqrt(g_var + eps)
    mean_c = jnp.repeat(g_mean, cg, axis=-1)               # (B, C)
    rstd_c = jnp.repeat(g_rstd, cg, axis=-1)               # (B, C)
    scale_c = (rstd_c * gamma)[:, None, :]                 # (B, 1, C)
    shift_c = (beta - mean_c * rstd_c * gamma)[:, None, :] # (B, 1, C)

    # ---------------- Kernel 3: apply GroupNorm affine ------------------------
    out = pl.pallas_call(
        _gn_apply_kernel,
        out_shape=jax.ShapeDtypeStruct((B, S, C), f32),
        grid=(B, nS),
        in_specs=[
            pl.BlockSpec((1, TS, C), lambda b, s: (b, s, 0)),
            pl.BlockSpec((1, 1, C), lambda b, s: (b, 0, 0)),
            pl.BlockSpec((1, 1, C), lambda b, s: (b, 0, 0)),
        ],
        out_specs=pl.BlockSpec((1, TS, C), lambda b, s: (b, s, 0)),
        compiler_params=stream_params,
    )(r, scale_c, shift_c)

    # (B, S, C) -> NCHW
    return jnp.transpose(out, (0, 2, 1)).reshape(B, C, Himg, Wimg)


def reference(x_nchw, params, *, num_heads, head_dim, groups, eps=1e-5):
    """Pure-JAX f32 reference matching the PyTorch forward."""
    B, C, H, W = x_nchw.shape
    S = H * W
    D = num_heads * head_dim
    hp = jax.lax.Precision.HIGHEST
    x = jnp.transpose(x_nchw.reshape(B, C, S), (0, 2, 1)).astype(jnp.float32)

    q = jnp.einsum("bsc,cd->bsd", x, params["wq"], precision=hp) + params["bq"]
    k = jnp.einsum("bsc,cd->bsd", x, params["wk"], precision=hp) + params["bk"]
    v = jnp.einsum("bsc,cd->bsd", x, params["wv"], precision=hp) + params["bv"]

    def split(t):
        return t.reshape(B, S, num_heads, head_dim).transpose(0, 2, 1, 3)
    qh, kh, vh = split(q), split(k), split(v)
    s = jnp.einsum("bhqd,bhkd->bhqk", qh, kh, precision=hp) * (head_dim ** -0.5)
    p = jax.nn.softmax(s, axis=-1)
    a = jnp.einsum("bhqk,bhkd->bhqd", p, vh, precision=hp)
    a = a.transpose(0, 2, 1, 3).reshape(B, S, D)

    y = jnp.einsum("bsd,dc->bsc", a, params["wp"], precision=hp) + params["bp"]
    r = x + y

    cg = C // groups
    rg = r.reshape(B, S, groups, cg).transpose(0, 2, 1, 3).reshape(B, groups, S * cg)
    mean = rg.mean(-1, keepdims=True)
    var = ((rg - mean) ** 2).mean(-1, keepdims=True)
    rn = (rg - mean) / jnp.sqrt(var + eps)
    rn = rn.reshape(B, groups, S, cg).transpose(0, 2, 1, 3).reshape(B, S, C)
    out = rn * params["gamma"] + params["beta"]
    return jnp.transpose(out, (0, 2, 1)).reshape(B, C, H, W)


if __name__ == "__main__":
    # Small, lane-friendly config (C and H*hd multiples of 128; C % groups == 0).
    B, C, Himg, Wimg = 2, 128, 16, 16
    num_heads, head_dim, groups = 2, 64, 8
    D = num_heads * head_dim

    key = jax.random.PRNGKey(0)
    keys = jax.random.split(key, 11)

    # Synthetic parameters (Conv2d 1x1 weights stored as (in, out) matrices).
    params = {
        "wq": 0.1 * jax.random.normal(keys[0], (C, D), jnp.float32),
        "bq": 0.05 * jax.random.normal(keys[1], (1, D), jnp.float32),
        "wk": 0.1 * jax.random.normal(keys[2], (C, D), jnp.float32),
        "bk": 0.05 * jax.random.normal(keys[3], (1, D), jnp.float32),
        "wv": 0.1 * jax.random.normal(keys[4], (C, D), jnp.float32),
        "bv": 0.05 * jax.random.normal(keys[5], (1, D), jnp.float32),
        "wp": 0.1 * jax.random.normal(keys[6], (D, C), jnp.float32),
        "bp": 0.05 * jax.random.normal(keys[7], (1, C), jnp.float32),
        "gamma": 1.0 + 0.1 * jax.random.normal(keys[8], (1, C), jnp.float32),
        "beta": 0.1 * jax.random.normal(keys[9], (1, C), jnp.float32),
    }
    x = jax.random.normal(keys[10], (B, C, Himg, Wimg), jnp.float32)

    out = flash_self_attention(
        x, params, num_heads=num_heads, head_dim=head_dim, groups=groups)
    out = jax.block_until_ready(out)

    ref = reference(
        x, params, num_heads=num_heads, head_dim=head_dim, groups=groups)
    ref = jax.block_until_ready(ref)

    assert out.shape == (B, C, Himg, Wimg)
    assert bool(jnp.all(jnp.isfinite(out)))
    max_err = float(jnp.max(jnp.abs(out - ref)))
    # bf16 MXU inputs with f32 accumulation -> slightly looser tolerance than
    # the pure-f32 HIGHEST-precision reference.
    assert bool(jnp.allclose(out, ref, atol=2e-2, rtol=2e-2)), max_err

    print("KERNEL_OK")
</pallas_src>

<mosaic_0001>
module attributes {stable_mosaic.version = 11 : i64} {
  func.func @_qkv_proj_kernel(%arg0: i32, %arg1: i32, %arg2: memref<1x256x128xf32, #tpu.memory_space<vmem>>, %arg3: memref<128x768xbf16, #tpu.memory_space<vmem>>, %arg4: memref<1x768xf32, #tpu.memory_space<vmem>>, %arg5: memref<1x2x256x128xbf16, #tpu.memory_space<vmem>>, %arg6: memref<1x2x256x128xbf16, #tpu.memory_space<vmem>>, %arg7: memref<1x2x256x128xbf16, #tpu.memory_space<vmem>>) attributes {dimension_semantics = [#tpu.dimension_semantics<parallel>, #tpu.dimension_semantics<parallel>], iteration_bounds = array<i64: 2, 1>, scalar_prefetch = 0 : i64, scratch_operands = 0 : i64, tpu.core_type = #tpu.core_type<tc>, window_params = [{transform_indices = @transform_0, window_bounds = array<i64: 1, 256, 128>}, {pipeline_mode = #tpu.pipeline_mode<synchronous>, transform_indices = @transform_1, window_bounds = array<i64: 128, 768>}, {pipeline_mode = #tpu.pipeline_mode<synchronous>, transform_indices = @transform_2, window_bounds = array<i64: 1, 768>}, {transform_indices = @transform_3, window_bounds = array<i64: 1, 2, 256, 128>}, {transform_indices = @transform_4, window_bounds = array<i64: 1, 2, 256, 128>}, {transform_indices = @transform_5, window_bounds = array<i64: 1, 2, 256, 128>}]} {
    %c0 = arith.constant 0 : index
    %c0_0 = arith.constant 0 : index
    %c0_1 = arith.constant 0 : index
    %0 = vector.load %arg2[%c0, %c0_0, %c0_1] : memref<1x256x128xf32, #tpu.memory_space<vmem>>, vector<1x256x128xf32>
    %1 = vector.shape_cast %0 : vector<1x256x128xf32> to vector<256x128xf32>
    %2 = arith.truncf %1 : vector<256x128xf32> to vector<256x128xbf16>
    %c0_2 = arith.constant 0 : index
    %c0_3 = arith.constant 0 : index
    %3 = vector.load %arg3[%c0_2, %c0_3] : memref<128x768xbf16, #tpu.memory_space<vmem>>, vector<128x768xbf16>
    %cst = arith.constant dense<0.000000e+00> : vector<256x768xf32>
    %4 = tpu.matmul %2, %3, %cst {dimension_numbers = #tpu.dot_dimension_numbers<[1], [0], [0], [1], [0, 0, 1, 1], [], []>} : vector<256x128xbf16>, vector<128x768xbf16>, vector<256x768xf32> -> vector<256x768xf32>
    %c0_4 = arith.constant 0 : index
    %c0_5 = arith.constant 0 : index
    %5 = vector.load %arg4[%c0_4, %c0_5] : memref<1x768xf32, #tpu.memory_space<vmem>>, vector<1x768xf32>
    %6 = vector.broadcast %5 : vector<1x768xf32> to vector<256x768xf32>
    %7 = arith.addf %4, %6 : vector<256x768xf32>
    %8 = arith.truncf %7 : vector<256x768xf32> to vector<256x768xbf16>
    %9 = vector.extract_strided_slice %8 {offsets = [0, 0], sizes = [256, 128], strides = [1, 1]} : vector<256x768xbf16> to vector<256x128xbf16>
    %c0_6 = arith.constant 0 : index
    %c0_7 = arith.constant 0 : index
    %c0_8 = arith.constant 0 : index
    %c0_9 = arith.constant 0 : index
    %10 = vector.load %arg5[%c0_6, %c0_7, %c0_8, %c0_9] : memref<1x2x256x128xbf16, #tpu.memory_space<vmem>>, vector<1x1x256x128xbf16>
    %11 = vector.shape_cast %10 : vector<1x1x256x128xbf16> to vector<256x128xbf16>
    %12 = vector.shape_cast %9 : vector<256x128xbf16> to vector<1x1x256x128xbf16>
    tpu.vector_store %arg5[%c0_6, %c0_7, %c0_8, %c0_9], %12 {strides = array<i32>} : memref<1x2x256x128xbf16, #tpu.memory_space<vmem>>, vector<1x1x256x128xbf16>,
    %13 = vector.extract_strided_slice %8 {offsets = [0, 128], sizes = [256, 128], strides = [1, 1]} : vector<256x768xbf16> to vector<256x128xbf16>
    %c0_10 = arith.constant 0 : index
    %c1 = arith.constant 1 : index
    %c0_11 = arith.constant 0 : index
    %c0_12 = arith.constant 0 : index
    %14 = vector.load %arg5[%c0_10, %c1, %c0_11, %c0_12] : memref<1x2x256x128xbf16, #tpu.memory_space<vmem>>, vector<1x1x256x128xbf16>
    %15 = vector.shape_cast %14 : vector<1x1x256x128xbf16> to vector<256x128xbf16>
    %16 = vector.shape_cast %13 : vector<256x128xbf16> to vector<1x1x256x128xbf16>
    tpu.vector_store %arg5[%c0_10, %c1, %c0_11, %c0_12], %16 {strides = array<i32>} : memref<1x2x256x128xbf16, #tpu.memory_space<vmem>>, vector<1x1x256x128xbf16>,
    %17 = vector.extract_strided_slice %8 {offsets = [0, 256], sizes = [256, 128], strides = [1, 1]} : vector<256x768xbf16> to vector<256x128xbf16>
    %c0_13 = arith.constant 0 : index
    %c0_14 = arith.constant 0 : index
    %c0_15 = arith.constant 0 : index
    %c0_16 = arith.constant 0 : index
    %18 = vector.load %arg6[%c0_13, %c0_14, %c0_15, %c0_16] : memref<1x2x256x128xbf16, #tpu.memory_space<vmem>>, vector<1x1x256x128xbf16>
    %19 = vector.shape_cast %18 : vector<1x1x256x128xbf16> to vector<256x128xbf16>
    %20 = vector.shape_cast %17 : vector<256x128xbf16> to vector<1x1x256x128xbf16>
    tpu.vector_store %arg6[%c0_13, %c0_14, %c0_15, %c0_16], %20 {strides = array<i32>} : memref<1x2x256x128xbf16, #tpu.memory_space<vmem>>, vector<1x1x256x128xbf16>,
    %21 = vector.extract_strided_slice %8 {offsets = [0, 384], sizes = [256, 128], strides = [1, 1]} : vector<256x768xbf16> to vector<256x128xbf16>
    %c0_17 = arith.constant 0 : index
    %c1_18 = arith.constant 1 : index
    %c0_19 = arith.constant 0 : index
    %c0_20 = arith.constant 0 : index
    %22 = vector.load %arg6[%c0_17, %c1_18, %c0_19, %c0_20] : memref<1x2x256x128xbf16, #tpu.memory_space<vmem>>, vector<1x1x256x128xbf16>
    %23 = vector.shape_cast %22 : vector<1x1x256x128xbf16> to vector<256x128xbf16>
    %24 = vector.shape_cast %21 : vector<256x128xbf16> to vector<1x1x256x128xbf16>
    tpu.vector_store %arg6[%c0_17, %c1_18, %c0_19, %c0_20], %24 {strides = array<i32>} : memref<1x2x256x128xbf16, #tpu.memory_space<vmem>>, vector<1x1x256x128xbf16>,
    %25 = vector.extract_strided_slice %8 {offsets = [0, 512], sizes = [256, 128], strides = [1, 1]} : vector<256x768xbf16> to vector<256x128xbf16>
    %c0_21 = arith.constant 0 : index
    %c0_22 = arith.constant 0 : index
    %c0_23 = arith.constant 0 : index
    %c0_24 = arith.constant 0 : index
    %26 = vector.load %arg7[%c0_21, %c0_22, %c0_23, %c0_24] : memref<1x2x256x128xbf16, #tpu.memory_space<vmem>>, vector<1x1x256x128xbf16>
    %27 = vector.shape_cast %26 : vector<1x1x256x128xbf16> to vector<256x128xbf16>
    %28 = vector.shape_cast %25 : vector<256x128xbf16> to vector<1x1x256x128xbf16>
    tpu.vector_store %arg7[%c0_21, %c0_22, %c0_23, %c0_24], %28 {strides = array<i32>} : memref<1x2x256x128xbf16, #tpu.memory_space<vmem>>, vector<1x1x256x128xbf16>,
    %29 = vector.extract_strided_slice %8 {offsets = [0, 640], sizes = [256, 128], strides = [1, 1]} : vector<256x768xbf16> to vector<256x128xbf16>
    %c0_25 = arith.constant 0 : index
    %c1_26 = arith.constant 1 : index
    %c0_27 = arith.constant 0 : index
    %c0_28 = arith.constant 0 : index
    %30 = vector.load %arg7[%c0_25, %c1_26, %c0_27, %c0_28] : memref<1x2x256x128xbf16, #tpu.memory_space<vmem>>, vector<1x1x256x128xbf16>
    %31 = vector.shape_cast %30 : vector<1x1x256x128xbf16> to vector<256x128xbf16>
    %32 = vector.shape_cast %29 : vector<256x128xbf16> to vector<1x1x256x128xbf16>
    tpu.vector_store %arg7[%c0_25, %c1_26, %c0_27, %c0_28], %32 {strides = array<i32>} : memref<1x2x256x128xbf16, #tpu.memory_space<vmem>>, vector<1x1x256x128xbf16>,
    return
  }
  func.func @transform_0(%arg0: i32, %arg1: i32) -> (i32, i32, i32) {
    %c0_i32 = arith.constant 0 : i32
    %c0_i32_0 = arith.constant 0 : i32
    return %arg0, %arg1, %c0_i32 : i32, i32, i32
  }
  func.func @transform_1(%arg0: i32, %arg1: i32) -> (i32, i32) {
    %c0_i32 = arith.constant 0 : i32
    %c0_i32_0 = arith.constant 0 : i32
    %c0_i32_1 = arith.constant 0 : i32
    return %c0_i32, %c0_i32_0 : i32, i32
  }
  func.func @transform_2(%arg0: i32, %arg1: i32) -> (i32, i32) {
    %c0_i32 = arith.constant 0 : i32
    %c0_i32_0 = arith.constant 0 : i32
    %c0_i32_1 = arith.constant 0 : i32
    return %c0_i32, %c0_i32_0 : i32, i32
  }
  func.func @transform_3(%arg0: i32, %arg1: i32) -> (i32, i32, i32, i32) {
    %c0_i32 = arith.constant 0 : i32
    %c0_i32_0 = arith.constant 0 : i32
    %c0_i32_1 = arith.constant 0 : i32
    return %arg0, %c0_i32, %arg1, %c0_i32_0 : i32, i32, i32, i32
  }
  func.func @transform_4(%arg0: i32, %arg1: i32) -> (i32, i32, i32, i32) {
    %c0_i32 = arith.constant 0 : i32
    %c0_i32_0 = arith.constant 0 : i32
    %c0_i32_1 = arith.constant 0 : i32
    return %arg0, %c0_i32, %arg1, %c0_i32_0 : i32, i32, i32, i32
  }
  func.func @transform_5(%arg0: i32, %arg1: i32) -> (i32, i32, i32, i32) {
    %c0_i32 = arith.constant 0 : i32
    %c0_i32_0 = arith.constant 0 : i32
    %c0_i32_1 = arith.constant 0 : i32
    return %arg0, %c0_i32, %arg1, %c0_i32_0 : i32, i32, i32, i32
  }
}

</mosaic_0001>

<bundles_post_ra>
// kernel: tpu_custom_call.1
= control target key start
LH: loop header
LB: loop body
LE: loop exit
PB: predicated region body
PF: predicated region fallthrough
CT: control target
= control target key end

     0   :  { %11 = vsyncpa [#allocation3], 0  ;;  %s4765_s0 = inlined_call_operand.hbm [shape: f32[2,256,128], index: 0, kind: input, shape index: {}]   ;;  %s4766_s1 = inlined_call_operand.hbm [shape: bf16[128,768], index: 1, kind: input, shape index: {}]   ;;  %s4767_s2 = inlined_call_operand.vmem [shape: f32[1,768], index: 2, kind: input, shape index: {}]   ;;  %s4768_s3 = inlined_call_operand.hbm [shape: bf16[2,2,256,128], index: 3, kind: output, shape index: {0}]   ;;  %s4769_s4 = inlined_call_operand.hbm [shape: bf16[2,2,256,128], index: 4, kind: output, shape index: {1}]   ;;  %s4770_s5 = inlined_call_operand.hbm [shape: bf16[2,2,256,128], index: 5, kind: output, shape index: {2}]  }
   0x1   :  { %13 = vsyncpa [#allocation3 + $0x1], 0 }
   0x2   :  { %14 = vsyncpa [#allocation6], 0 }
   0x3   :  { %15 = vsyncpa [#allocation4], 0 }
   0x4   :  { %17 = vsyncpa [#allocation4 + $0x1], 0 }
   0x5   :  { %18 = vsyncpa [#allocation9], 0 }
   0x6   :  { %20 = vsyncpa [#allocation9 + $0x1], 0  ;;  %s3995_s18 = smov 0   ;;  %s3997_s19 = smov 0  }
   0x7   :  { %s3999_s20 = smov 0   ;;  %s4001_s21 = smov 0  }
   0x8   :  { %s4003_s22 = smov 0   ;;  %s4005_s23 = smov 0  }
   0x9 LB: > { %s4026_s24 = sadd.s32 4294967295, %s3951_s23   ;;  %s4774_s25 = sadd.s32 4294967294, %s3951_s23   ;;  %s3951_s23 = sphi %s4005_s23, %s26_s23   ;;  %s3947_s22 = sphi %s4003_s22, %s4797_s22   ;;  %s3943_s21 = sphi %s4001_s21, %s4796_s21   ;;  %s3939_s20 = sphi %s3999_s20, %s4795_s20   ;;  %s3935_s19 = sphi %s3997_s19, %s4794_s19   ;;  %s3931_s18 = sphi %s3995_s18, %s4793_s18  }
   0xa   : > { %p60_p0 = scmp.ne.s32.totalorder %s3935_s19, %s3931_s18  ;;  %p4771_p1 = scmp.eq.s32.totalorder %s4026_s24, 0 }
   0xb   : > { %p134_p3 = scmp.eq.s32.totalorder %s4774_s25, 1  ;;  %p2441_p5 = scmp.ge.s32.totalorder %s3951_s23, 1 }
   0xc   : > { %p4037_p4 = por %p4771_p1, %p60_p0  ;;  %p197_p7 = scmp.lt.s32.totalorder %s3951_s23, 3 }
   0xd   : > { %p4042_p6 = por %p134_p3, %p60_p0  ;;  %s3953_s29 = smov [#allocation5]  }
   0xe   : > { %s4777_s26 = scalar_select %p4037_p4, 1, 0 }
   0xf   : > { %s4778_s27 = scalar_select %p4042_p6, 1, 0 }
  0x10   : > { %p4047_p8 = pnand %p2441_p5, %p197_p7  ;;  %s209_s30 = sshll.u32 %s3953_s29, 4  ;;  %s210_s30 = int_to_ptr.vmem [resolvable:$true] %s209_s30 }
  0x11   : > { %s38_s7 = sadd.s32 1, %s3947_s22  ;;  %s3747_s10 = scalar_lea.hbm %s4766_s1, 6144 }
  0x12   : > { %s4779_s28 = scalar_select %p4047_p8, 1, 0 }
  0x13   : > { %p3597_p9 = pneg %p4047_p8  ;;  %p3748_p12 = scmp.ne.s32.totalorder %s4766_s1, %s3747_s10 }
  0x14   : > { %p3754_p5 = scmp.lt.u32.totalorder %s3747_s10, %s4766_s1 }
  0x15   : > { %p4056_p11 = pnand %p3597_p9, %p4771_p1 }
  0x17   : > { %p3749_p13 = pneg %p4056_p11 }
  0x19   : > { %p3750_p0 = pnand %p3749_p13, %p3748_p12 }
  0x1b   : > { %p3751_p3 = pneg %p3750_p0 }
  0x1d   : > { %p3756_p7 = pnand %p3754_p5, %p3751_p3 }
  0x1f   : > { %3759 = shalt.err (!%p3756_p7)
}
  0x20   : > { %s3760_s15 = scalar_lea.vmem %s210_s30, 6144  ;;  %p3768_p2 = scmp.lt.s32.totalorder %s210_s30, %s210_s30 }
  0x21   : > { %p3761_p9 = scmp.ne.s32.totalorder %s210_s30, %s3760_s15  ;;  %p3769_p6 = scmp.lt.s32.totalorder %s3760_s15, %s3760_s15 }
  0x23   : > { %p3763_p10 = pnand %p3761_p9, %p3749_p13  ;;  %p3770_p4 = por %p3769_p6, %p3768_p2 }
  0x25   : > { %p3764_p1 = pneg %p3763_p10 }
  0x27   : > { %p3771_p8 = pnand %p3770_p4, %p3764_p1 }
  0x29   : > { %3774 = shalt.err (!%p3771_p8)
}
  0x2a   : > { %s3954_s16 = smov 384   ;;  %s3955_s17 = smov 24  }
  0x2b   : > { %3600 = dma.hbm_to_vmem [thread:$0]  (!%p4056_p11), %s4766_s1, 6144, %s210_s30, [#allocation6], %s3954_s16, %s3954_s16, %s3955_s17  }
  0x2c   : > { %p40_p1 = scmp.ge.s32.totalorder %s38_s7, 2  ;;  %s47_s9 = sadd.s32 1, %s3939_s20 }
  0x2d   : > { %p54_p2 = scmp.ne.s32.totalorder %s3939_s20, %s3935_s19  ;;  %p55_p4 = scmp.eq.s32.totalorder %s3951_s23, 0 }
  0x2e   : > { %s4799_s7 = smov (%p40_p1, %s38_s7), 0  ;;  %p4782_p8 = scmp.eq.s32.totalorder %s4026_s24, 1 }
  0x2f   : > { %p4083_p6 = por %p55_p4, %p54_p2  ;;  %s42_s6 = ssub.s32 %s3947_s22, %s4799_s7 }
  0x30   : > { %p4089_p10 = por %p4782_p8, %p54_p2  ;;  %p3616_p12 = scmp.lt.s32.totalorder %s3951_s23, 2 }
  0x31   : > { %p45_p11 = scmp.eq.s32.totalorder %s42_s6, 0  ;;  %s226_s30 = sand.u32 1, %s3939_s20  }
  0x32   : > { %s2444_s12 = sshll.u32 %s226_s30, 8  ;;  %s2800_s14 = sshll.u32 %s3947_s22, 12 }
  0x33   : > { %s4098_s13 = scalar_select %p45_p11, %s3939_s20, %s47_s9  }
  0x34   : > { %s4104_s17 = scalar_lea.hbm %s4765_s0, %s2800_s14  ;;  %s230_s29 = scalar_lea.vmem [#allocation2], %s2444_s12 }
  0x35   : > { %s239_s8 = sshll.u32 %s230_s29, 4  ;;  %p4110_p13 = pnand %p3616_p12, %p4083_p6  ;;  %s4106_s8 = int_to_ptr.vmem [resolvable:$true] %s239_s8 }
  0x36   : > { %s4114_s9 = scalar_lea.sflag [#allocation3], %s226_s30  ;;  %s3775_s15 = scalar_lea.hbm %s4104_s17, 4096 }
  0x37   : > { %p3776_p0 = scmp.ne.s32.totalorder %s4104_s17, %s3775_s15  ;;  %p3777_p3 = pneg %p4110_p13 }
  0x38   : > { %s3780_s10 = scalar_lea.hbm %s4765_s0, 8192  ;;  %p3781_p9 = scmp.lt.u32.totalorder %s4104_s17, %s4765_s0 }
  0x39   : > { %p3778_p5 = pnand %p3777_p3, %p3776_p0  ;;  %p3782_p1 = scmp.lt.u32.totalorder %s3780_s10, %s3775_s15 }
  0x3a   : > { %p3784_p4 = scmp.lt.u32.totalorder %s3775_s15, %s4104_s17 }
  0x3b   : > { %p3779_p7 = pneg %p3778_p5  ;;  %p3783_p2 = por %p3782_p1, %p3781_p9 }
  0x3d   : > { %p3785_p6 = por %p3784_p4, %p3783_p2 }
  0x3f   : > { %p3786_p8 = pnand %p3785_p6, %p3779_p7 }
  0x41   : > { %3789 = shalt.err (!%p3786_p8)
}
  0x42   : > { %s3790_s30 = scalar_lea.vmem %s4106_s8, 4096  ;;  %s3956_s12 = smov [#allocation2]  }
  0x43   : > { %p3791_p12 = scmp.ne.s32.totalorder %s4106_s8, %s3790_s30  ;;  %s3795_s14 = sshll.u32 %s3956_s12, 4  ;;  %s3796_s14 = int_to_ptr.vmem [resolvable:$false] %s3795_s14 }
  0x44   : > { %s3797_s16 = scalar_lea.vmem %s3796_s14, 8192  ;;  %p3798_p5 = scmp.lt.s32.totalorder %s4106_s8, %s3796_s14 }
  0x45   : > { %p3793_p11 = pnand %p3791_p12, %p3777_p3  ;;  %p3799_p9 = scmp.lt.s32.totalorder %s3797_s16, %s3790_s30 }
  0x47   : > { %p3794_p0 = pneg %p3793_p11  ;;  %p3800_p1 = por %p3799_p9, %p3798_p5 }
  0x49   : > { %p3801_p2 = pnand %p3800_p1, %p3794_p0 }
  0x4b   : > { %3804 = shalt.err (!%p3801_p2)
}
  0x4c   : > { %s3957_s15 = smov 128   ;;  %s3958_s10 = smov 8  }
  0x4d   : > { %3604 = dma.hbm_to_vmem [thread:$0]  (!%p4110_p13), %s4104_s17, 4096, %s4106_s8, %s4114_s9, %s3957_s15, %s3957_s15, %s3958_s10  }
  0x4e   : > { %p4785_p3 = scmp.ne.s32.totalorder %s4779_s28, 0 }
  0x4f   : > { %s4145_s29 = sand.u32 (!%p4785_p3), 1, %s3935_s19   ;;  %p4786_p7 = scmp.ne.s32.totalorder (!%p4785_p3), %s4777_s26, 0 }
  0x50   : > { %251 = sbr.rel (%p4785_p3) target bundleno = 565 (0x235), region = 32  ;;  %s4148_s30 = sshll.u32 (!%p4785_p3), %s4145_s29, 8 }
  0x51   : > { %s254_s12 = scalar_lea.sflag (!%p4785_p3), [#allocation3], %s4145_s29  ;;  %s4152_s14 = scalar_lea.vmem (!%p4785_p3), [#allocation2], %s4148_s30 }
  0x57   : > { %3914 = dma.done.wait (%p4786_p7), %s254_s12, 4096  }
  0x58   : > { %3916 = vsyncadd (%p4786_p7), %s254_s12, 4294963200  ;;  %p4787_p13 = scmp.eq.s32.totalorder %s4026_s24, 0 }
  0x5a   : > { %3918 = dma.done.wait (%p4787_p13), [#allocation6], 6144   ;;  %p4788_p4 = pmov %p4787_p13 }
  0x5b   : > { %v3959_v0 = vmov 0   ;;  %v3675_v1 = vld [vmem:[#allocation5 + $0x4] ss:$24 sps:$4 sm:$0xff]   ;;  %v3677_v2 = vld [vmem:[#allocation5] ss:$24 sps:$4 sm:$0xff]   ;;  %v304_v18 = vld [vmem:[%s4152_s14 + $0x8] sm:$0xff] }
  0x5c   : > { %3920 = vsyncadd (%p4788_p4), [#allocation6], 4294961152  ;;  %703 = vmatprep.mubr.bf16.mxu0 %v3959_v0  ;;  %783 = vmatprep.mubr.bf16.mxu1 %v3959_v0  ;;  %v3678_v3 = vld [vmem:[#allocation5 + $0x34] ss:$24 sps:$4 sm:$0xff]   ;;  %v3680_v4 = vld [vmem:[#allocation5 + $0x30] ss:$24 sps:$4 sm:$0xff]  }
  0x5d   : > { %671 = vmatprep.subr.bf16.mxu0 %v3675_v1  ;;  %3569 = vmatprep.subr.bf16.mxu1 %v3675_v1  ;;  %v3681_v5 = vld [vmem:[#allocation5 + $0x64] ss:$24 sps:$4 sm:$0xff]   ;;  %v3683_v6 = vld [vmem:[#allocation5 + $0x60] ss:$24 sps:$4 sm:$0xff]   ;;  %v3684_v7 = vld [vmem:[#allocation5 + $0x94] ss:$24 sps:$4 sm:$0xff]  }
  0x5e   : > { %672 = vmatpush1.bf16.msra.mxu0 %v3677_v2  ;;  %3577 = vmatpush1.bf16.msra.mxu1 %v3677_v2  ;;  %v3686_v8 = vld [vmem:[#allocation5 + $0x90] ss:$24 sps:$4 sm:$0xff]   ;;  %v3687_v9 = vld [vmem:[#allocation5 + $0xc4] ss:$24 sps:$4 sm:$0xff]   ;;  %v3689_v10 = vld [vmem:[#allocation5 + $0xc0] ss:$24 sps:$4 sm:$0xff]  }
  0x5f   : > { %673 = vmatprep.subr.bf16.mxu0 %v3678_v3  ;;  %3570 = vmatprep.subr.bf16.mxu1 %v3678_v3  ;;  %v3690_v11 = vld [vmem:[#allocation5 + $0xf4] ss:$24 sps:$4 sm:$0xff]   ;;  %v3692_v12 = vld [vmem:[#allocation5 + $0xf0] ss:$24 sps:$4 sm:$0xff]   ;;  %v3693_v13 = vld [vmem:[#allocation5 + $0x124] ss:$24 sps:$4 sm:$0xff]  }
  0x60   : > { %v3695_v14 = vld [vmem:[#allocation5 + $0x120] ss:$24 sps:$4 sm:$0xff]   ;;  %v3696_v15 = vld [vmem:[#allocation5 + $0x154] ss:$24 sps:$4 sm:$0xff]   ;;  %v3698_v16 = vld [vmem:[#allocation5 + $0x150] ss:$24 sps:$4 sm:$0xff]  }
  0x61   : > { %v303_v17 = vld [vmem:[%s4152_s14] sm:$0xff]  ;;  %v320_v20 = vld [vmem:[%s4152_s14 + $0x88] sm:$0xff]  ;;  %v3707_v27 = vld [vmem:[#allocation5 + $0x3c] ss:$24 sps:$4 sm:$0xff]   ;;  %s4326_s17 = scalar_lea.vmem [#allocation7], %s4148_s30  ;;  %s4434_s8 = sshll.u32 %s3943_s21, 12 }
  0x62   : > { %674 = vmatpush1.bf16.msra.mxu0 %v3680_v4  ;;  %3578 = vmatpush1.bf16.msra.mxu1 %v3680_v4  ;;  %v319_v19 = vld [vmem:[%s4152_s14 + $0x80] sm:$0xff]  ;;  %v3704_v22 = vld [vmem:[#allocation5 + $0x14] ss:$24 sps:$4 sm:$0xff]   ;;  %v4168_v23 = vpack.c.bf16 %v304_v18, %v303_v17  ;;  %v3702_v26 = vld [vmem:[#allocation5 + $0x10] ss:$24 sps:$4 sm:$0xff]   ;;  %s4447_s9 = scalar_lea.hbm %s4768_s3, %s4434_s8  ;;  %s2239_s16 = sshll.u32 %s4326_s17, 4  ;;  %s4450_s16 = int_to_ptr.vmem [resolvable:$true] %s2239_s16 }
  0x63   : > { %675 = vmatprep.subr.bf16.mxu0 %v3681_v5  ;;  %3571 = vmatprep.subr.bf16.mxu1 %v3681_v5  ;;  %v3701_v21 = vld [vmem:[#allocation5 + $0xc] ss:$24 sps:$4 sm:$0xff]   ;;  %v4170_v24 = vpack.c.bf16 %v320_v20, %v319_v19  ;;  %v3699_v25 = vld [vmem:[#allocation5 + $0x8] ss:$24 sps:$4 sm:$0xff]   ;;  %v305_v28 = vld [vmem:[%s4152_s14 + $0x10] sm:$0xff]  ;;  %s2214_s15 = scalar_lea.sflag [#allocation4], %s4145_s29 }
  0x64   : > { %v3710_v29 = vld [vmem:[#allocation5 + $0x44] ss:$24 sps:$4 sm:$0xff]   ;;  %v321_v31 = vld [vmem:[%s4152_s14 + $0x90] sm:$0xff]  ;;  %v3708_v34 = vld [vmem:[#allocation5 + $0x40] ss:$24 sps:$4 sm:$0xff]   ;;  %s3805_s10 = scalar_lea.vmem %s4450_s16, 4096 }
  0x65   : > { %v306_v30 = vld [vmem:[%s4152_s14 + $0x18] sm:$0xff]  ;;  %v3713_v35 = vld [vmem:[#allocation5 + $0x6c] ss:$24 sps:$4 sm:$0xff]   ;;  %v3711_v39 = vld [vmem:[#allocation5 + $0x68] ss:$24 sps:$4 sm:$0xff]   ;;  %p3806_p6 = scmp.ne.s32.totalorder %s4450_s16, %s3805_s10  ;;  %s3960_s12 = smov [#allocation7]  }
  0x66   : > { %676 = vmatpush1.bf16.msra.mxu0 %v3683_v6  ;;  %3579 = vmatpush1.bf16.msra.mxu1 %v3683_v6  ;;  %v322_v32 = vld [vmem:[%s4152_s14 + $0x98] sm:$0xff]  ;;  %v3716_v36 = vld [vmem:[#allocation5 + $0x74] ss:$24 sps:$4 sm:$0xff]   ;;  %v4180_v37 = vpack.c.bf16 %v306_v30, %v305_v28  ;;  %v3714_v40 = vld [vmem:[#allocation5 + $0x70] ss:$24 sps:$4 sm:$0xff]  }
  0x67   : > { %677 = vmatprep.subr.bf16.mxu0 %v3684_v7  ;;  %3572 = vmatprep.subr.bf16.mxu1 %v3684_v7  ;;  %v3705_v33 = vld [vmem:[#allocation5 + $0x38] ss:$24 sps:$4 sm:$0xff]   ;;  %v4182_v38 = vpack.c.bf16 %v322_v32, %v321_v31  ;;  %v3719_v41 = vld [vmem:[#allocation5 + $0x9c] ss:$24 sps:$4 sm:$0xff]   ;;  %v307_v43 = vld [vmem:[%s4152_s14 + $0x20] sm:$0xff]  ;;  %p3807_p8 = pnand %p3806_p6, %p4089_p10 }
  0x68   : > { %v3722_v42 = vld [vmem:[#allocation5 + $0xa4] ss:$24 sps:$4 sm:$0xff]   ;;  %v308_v44 = vld [vmem:[%s4152_s14 + $0x28] sm:$0xff]  ;;  %v3717_v47 = vld [vmem:[#allocation5 + $0x98] ss:$24 sps:$4 sm:$0xff]  }
  0x69   : > { %v323_v45 = vld [vmem:[%s4152_s14 + $0xa0] sm:$0xff]  ;;  %v324_v46 = vld [vmem:[%s4152_s14 + $0xa8] sm:$0xff]  ;;  %v4192_v51 = vpack.c.bf16 %v308_v44, %v307_v43  ;;  %v3731_v55 = vld [vmem:[#allocation5 + $0xfc] ss:$24 sps:$4 sm:$0xff]   ;;  %p3808_p12 = pneg %p3807_p8 }
  0x6a   : > { %678 = vmatpush1.bf16.msra.mxu0 %v3686_v8  ;;  %3580 = vmatpush1.bf16.msra.mxu1 %v3686_v8  ;;  %v3720_v48 = vld [vmem:[#allocation5 + $0xa0] ss:$24 sps:$4 sm:$0xff]   ;;  %v3725_v49 = vld [vmem:[#allocation5 + $0xcc] ss:$24 sps:$4 sm:$0xff]   ;;  %v4194_v52 = vpack.c.bf16 %v324_v46, %v323_v45  ;;  %v3726_v54 = vld [vmem:[#allocation5 + $0xd0] ss:$24 sps:$4 sm:$0xff]  }
  0x6b   : > { %679 = vmatprep.subr.bf16.mxu0 %v3687_v9  ;;  %3573 = vmatprep.subr.bf16.mxu1 %v3687_v9  ;;  %v3728_v50 = vld [vmem:[#allocation5 + $0xd4] ss:$24 sps:$4 sm:$0xff]   ;;  %v3723_v53 = vld [vmem:[#allocation5 + $0xc8] ss:$24 sps:$4 sm:$0xff]   ;;  %v3734_v56 = vld [vmem:[#allocation5 + $0x104] ss:$24 sps:$4 sm:$0xff]  }
  0x6c   : > { %v309_v57 = vld [vmem:[%s4152_s14 + $0x30] sm:$0xff]  ;;  %v310_v58 = vld [vmem:[%s4152_s14 + $0x38] sm:$0xff]  ;;  %v3737_v63 = vld [vmem:[#allocation5 + $0x12c] ss:$24 sps:$4 sm:$0xff]  }
  0x6d   : > { %v325_v59 = vld [vmem:[%s4152_s14 + $0xb0] sm:$0xff]  ;;  %v326_v60 = vld [vmem:[%s4152_s14 + $0xb8] sm:$0xff]  ;;  %v4204_v2 = vpack.c.bf16 %v310_v58, %v309_v57  ;;  %v3735_v4 = vld [vmem:[#allocation5 + $0x128] ss:$24 sps:$4 sm:$0xff]  }
  0x6e   : > { %680 = vmatpush1.bf16.msra.mxu0 %v3689_v10  ;;  %3581 = vmatpush1.bf16.msra.mxu1 %v3689_v10  ;;  %v3729_v61 = vld [vmem:[#allocation5 + $0xf8] ss:$24 sps:$4 sm:$0xff]   ;;  %v3740_v1 = vld [vmem:[#allocation5 + $0x134] ss:$24 sps:$4 sm:$0xff]   ;;  %v4206_v3 = vpack.c.bf16 %v326_v60, %v325_v59  ;;  %v3746_v7 = vld [vmem:[#allocation5 + $0x164] ss:$24 sps:$4 sm:$0xff]  }
  0x6f   : > { %681 = vmatprep.subr.bf16.mxu0 %v3690_v11  ;;  %3574 = vmatprep.subr.bf16.mxu1 %v3690_v11  ;;  %v3732_v62 = vld [vmem:[#allocation5 + $0x100] ss:$24 sps:$4 sm:$0xff]   ;;  %v3738_v5 = vld [vmem:[#allocation5 + $0x130] ss:$24 sps:$4 sm:$0xff]   ;;  %v3743_v6 = vld [vmem:[#allocation5 + $0x15c] ss:$24 sps:$4 sm:$0xff]  }
  0x70   : > { %v311_v8 = vld [vmem:[%s4152_s14 + $0x40] sm:$0xff]  ;;  %v312_v9 = vld [vmem:[%s4152_s14 + $0x48] sm:$0xff]  ;;  %v314_v17 = vld [vmem:[%s4152_s14 + $0x58] sm:$0xff] }
  0x71   : > { %v327_v10 = vld [vmem:[%s4152_s14 + $0xc0] sm:$0xff]  ;;  %v328_v11 = vld [vmem:[%s4152_s14 + $0xc8] sm:$0xff]  ;;  %v329_v18 = vld [vmem:[%s4152_s14 + $0xd0] sm:$0xff] }
  0x72   : > { %682 = vmatpush1.bf16.msra.mxu0 %v3692_v12  ;;  %3582 = vmatpush1.bf16.msra.mxu1 %v3692_v12  ;;  %v3741_v12 = vld [vmem:[#allocation5 + $0x158] ss:$24 sps:$4 sm:$0xff]  }
  0x73   : > { %683 = vmatprep.subr.bf16.mxu0 %v3693_v13  ;;  %3575 = vmatprep.subr.bf16.mxu1 %v3693_v13  ;;  %v3744_v13 = vld [vmem:[#allocation5 + $0x160] ss:$24 sps:$4 sm:$0xff]   ;;  %v317_v30 = vld [vmem:[%s4152_s14 + $0x70] sm:$0xff] }
  0x74   : > { %v330_v19 = vld [vmem:[%s4152_s14 + $0xd8] sm:$0xff]  ;;  %v333_v32 = vld [vmem:[%s4152_s14 + $0xf0] sm:$0xff] }
  0x75   : > { %v318_v31 = vld [vmem:[%s4152_s14 + $0x78] sm:$0xff] }
  0x76   : > { %684 = vmatpush1.bf16.msra.mxu0 %v3695_v14  ;;  %3583 = vmatpush1.bf16.msra.mxu1 %v3695_v14  ;;  %v339_v14 = vpack.c.bf16 %v312_v9, %v311_v8 }
  0x77   : > { %685 = vmatprep.subr.bf16.mxu0 %v3696_v15  ;;  %3576 = vmatprep.subr.bf16.mxu1 %v3696_v15  ;;  %v4216_v15 = vpack.c.bf16 %v328_v11, %v327_v10 }
  0x7a   : > { %686 = vmatpush1.bf16.msra.mxu0 %v3698_v16  ;;  %3584 = vmatpush1.bf16.msra.mxu1 %v3698_v16  ;;  %v313_v16 = vld [vmem:[%s4152_s14 + $0x50] sm:$0xff] }
  0x7b   : > { %864 = vmatprep.subr.bf16.mxu1 %v3701_v21  ;;  %1057 = vmatprep.subr.bf16.mxu0 %v3704_v22  ;;  %v340_v20 = vpack.c.bf16 %v314_v17, %v313_v16  ;;  %v4225_v21 = vpack.c.bf16 %v330_v19, %v329_v18  ;;  %v315_v22 = vld [vmem:[%s4152_s14 + $0x60] sm:$0xff] }
  0x7d   : > { %704 = vmatmul.mubr.bf16.vlgmr.msra.gmra.mrb[0].mxu0 %v4168_v23  ;;  %784 = vmatmul.mubr.bf16.vlgmr.msra.gmra.mrb[0].mxu1 %v4170_v24 }
  0x7e   : > { %865 = vmatpush1.bf16.msra.mxu1 %v3699_v25  ;;  %1058 = vmatpush1.bf16.msra.mxu0 %v3702_v26  ;;  %v316_v25 = vld [vmem:[%s4152_s14 + $0x68] sm:$0xff]  ;;  %v331_v26 = vld [vmem:[%s4152_s14 + $0xe0] sm:$0xff] }
  0x7f   : > { %713 = vmatprep.mubr.bf16.mxu0 %v3959_v0  ;;  %793 = vmatprep.mubr.bf16.mxu1 %v3959_v0  ;;  %v341_v28 = vpack.c.bf16 %v316_v25, %v315_v22 }
  0x80   : > { %866 = vmatprep.subr.bf16.mxu1 %v3707_v27  ;;  %1059 = vmatprep.subr.bf16.mxu0 %v3710_v29  ;;  %v332_v27 = vld [vmem:[%s4152_s14 + $0xe8] sm:$0xff] }
  0x81   : > { %v4234_v29 = vpack.c.bf16 %v332_v27, %v331_v26 }
  0x82   : > { %867 = vmatpush1.bf16.msra.mxu1 %v3705_v33  ;;  %1060 = vmatpush1.bf16.msra.mxu0 %v3708_v34  ;;  %v334_v33 = vld [vmem:[%s4152_s14 + $0xf8] sm:$0xff]  ;;  %v342_v34 = vpack.c.bf16 %v318_v31, %v317_v30  ;;  %s3809_s14 = sshll.u32 %s3960_s12, 4  ;;  %s3810_s14 = int_to_ptr.vmem [resolvable:$false] %s3809_s14 }
  0x83   : > { %868 = vmatprep.subr.bf16.mxu1 %v3713_v35  ;;  %1061 = vmatprep.subr.bf16.mxu0 %v3716_v36  ;;  %v4243_v35 = vpack.c.bf16 %v334_v33, %v333_v32  ;;  %s3811_s26 = scalar_lea.vmem %s3810_s14, 8192  ;;  %p3812_p11 = scmp.lt.s32.totalorder %s4450_s16, %s3810_s14 }
  0x84   : > { %p3813_p0 = scmp.lt.s32.totalorder %s3811_s26, %s3805_s10 }
  0x85   : > { %714 = vmatmul.mubr.bf16.gmra.mrb[4].mxu0 %v4180_v37  ;;  %794 = vmatmul.mubr.bf16.gmra.mrb[4].mxu1 %v4182_v38 }
  0x86   : > { %723 = vmatprep.mubr.bf16.mxu0 %v3959_v0  ;;  %803 = vmatprep.mubr.bf16.mxu1 %v3959_v0  ;;  %p3814_p5 = por %p3813_p0, %p3812_p11 }
  0x87   : > { %869 = vmatpush1.bf16.msra.mxu1 %v3711_v39  ;;  %1062 = vmatpush1.bf16.msra.mxu0 %v3714_v40 }
  0x88   : > { %870 = vmatprep.subr.bf16.mxu1 %v3719_v41  ;;  %1063 = vmatprep.subr.bf16.mxu0 %v3722_v42  ;;  %p3815_p9 = pnand %p3814_p5, %p3808_p12 }
  0x8b   : > { %871 = vmatpush1.bf16.msra.mxu1 %v3717_v47  ;;  %1064 = vmatpush1.bf16.msra.mxu0 %v3720_v48 }
  0x8c   : > { %872 = vmatprep.subr.bf16.mxu1 %v3725_v49  ;;  %1065 = vmatprep.subr.bf16.mxu0 %v3728_v50 }
  0x8d   : > { %724 = vmatmul.mubr.bf16.gmra.mrb[8].mxu0 %v4192_v51  ;;  %804 = vmatmul.mubr.bf16.gmra.mrb[8].mxu1 %v4194_v52 }
  0x8e   : > { %733 = vmatprep.mubr.bf16.mxu0 %v3959_v0  ;;  %813 = vmatprep.mubr.bf16.mxu1 %v3959_v0 }
  0x8f   : > { %873 = vmatpush1.bf16.msra.mxu1 %v3723_v53  ;;  %1066 = vmatpush1.bf16.msra.mxu0 %v3726_v54 }
  0x90   : > { %874 = vmatprep.subr.bf16.mxu1 %v3731_v55  ;;  %1067 = vmatprep.subr.bf16.mxu0 %v3734_v56 }
  0x93   : > { %875 = vmatpush1.bf16.msra.mxu1 %v3729_v61  ;;  %1068 = vmatpush1.bf16.msra.mxu0 %v3732_v62 }
  0x94   : > { %876 = vmatprep.subr.bf16.mxu1 %v3737_v63  ;;  %1069 = vmatprep.subr.bf16.mxu0 %v3740_v1 }
  0x95   : > { %734 = vmatmul.mubr.bf16.gmra.mrb[12].mxu0 %v4204_v2  ;;  %814 = vmatmul.mubr.bf16.gmra.mrb[12].mxu1 %v4206_v3 }
  0x96   : > { %743 = vmatprep.mubr.bf16.mxu0 %v3959_v0  ;;  %823 = vmatprep.mubr.bf16.mxu1 %v3959_v0 }
  0x97   : > { %877 = vmatpush1.bf16.msra.mxu1 %v3735_v4  ;;  %1070 = vmatpush1.bf16.msra.mxu0 %v3738_v5 }
  0x98   : > { %878 = vmatprep.subr.bf16.mxu1 %v3743_v6  ;;  %1071 = vmatprep.subr.bf16.mxu0 %v3746_v7 }
  0x9b   : > { %879 = vmatpush1.bf16.msra.mxu1 %v3741_v12  ;;  %1072 = vmatpush1.bf16.msra.mxu0 %v3744_v13 }
  0x9d   : > { %744 = vmatmul.mubr.bf16.gmra.mrb[16].mxu0 %v339_v14  ;;  %824 = vmatmul.mubr.bf16.gmra.mrb[16].mxu1 %v4216_v15 }
  0x9e   : > { %753 = vmatprep.mubr.bf16.mxu0 %v3959_v0  ;;  %833 = vmatprep.mubr.bf16.mxu1 %v3959_v0 }
  0xa5   : > { %754 = vmatmul.mubr.bf16.gmra.mrb[20].mxu0 %v340_v20  ;;  %834 = vmatmul.mubr.bf16.gmra.mrb[20].mxu1 %v4225_v21 }
  0xa6   : > { %763 = vmatprep.mubr.bf16.mxu0 %v3959_v0  ;;  %843 = vmatprep.mubr.bf16.mxu1 %v3959_v0 }
  0xad   : > { %764 = vmatmul.mubr.bf16.gmra.mrb[24].mxu0 %v341_v28  ;;  %844 = vmatmul.mubr.bf16.gmra.mrb[24].mxu1 %v4234_v29 }
  0xae   : > { %773 = vmatprep.mubr.bf16.mxu0 %v3959_v0  ;;  %853 = vmatprep.mubr.bf16.mxu1 %v3959_v0 }
  0xb5   : > { %774 = vmatmul.mubr.bf16.gmra.mrb[28].mxu0 %v342_v34  ;;  %854 = vmatmul.mubr.bf16.gmra.mrb[28].mxu1 %v4243_v35 }
  0xb6   : > { %896 = vmatprep.mubr.bf16.mxu1 %v3959_v0  ;;  %1089 = vmatprep.mubr.bf16.mxu0 %v3959_v0 }
  0xbd   : > { %897 = vmatmul.mubr.bf16.vlgmr.msra.gmra.mrb[32].mxu1 %v4168_v23  ;;  %1090 = vmatmul.mubr.bf16.vlgmr.msra.gmra.mrb[32].mxu0 %v4168_v23  ;;  %v401_v23 = vlaneseq }
  0xbe   : > { %906 = vmatprep.mubr.bf16.mxu1 %v3959_v0  ;;  %1099 = vmatprep.mubr.bf16.mxu0 %v3959_v0 }
  0xc5   : > { %907 = vmatmul.mubr.bf16.gmra.mrb[36].mxu1 %v4180_v37  ;;  %1100 = vmatmul.mubr.bf16.gmra.mrb[36].mxu0 %v4180_v37  ;;  %v4308_v37 = vld [vmem:[%s4767_s2] sm:$0x3f] }
  0xc6   : > { %916 = vmatprep.mubr.bf16.mxu1 %v3959_v0  ;;  %1109 = vmatprep.mubr.bf16.mxu0 %v3959_v0 }
  0xcd   : > { %917 = vmatmul.mubr.bf16.gmra.mrb[40].mxu1 %v4192_v51  ;;  %1110 = vmatmul.mubr.bf16.gmra.mrb[40].mxu0 %v4192_v51 }
  0xce   : > { %926 = vmatprep.mubr.bf16.mxu1 %v3959_v0  ;;  %1119 = vmatprep.mubr.bf16.mxu0 %v3959_v0 }
  0xd5   : > { %927 = vmatmul.mubr.bf16.gmra.mrb[44].mxu1 %v4204_v2  ;;  %1120 = vmatmul.mubr.bf16.gmra.mrb[44].mxu0 %v4204_v2 }
  0xd6   : > { %936 = vmatprep.mubr.bf16.mxu1 %v3959_v0  ;;  %1129 = vmatprep.mubr.bf16.mxu0 %v3959_v0 }
  0xdd   : > { %937 = vmatmul.mubr.bf16.gmra.mrb[48].mxu1 %v339_v14  ;;  %1130 = vmatmul.mubr.bf16.gmra.mrb[48].mxu0 %v339_v14 }
  0xde   : > { %946 = vmatprep.mubr.bf16.mxu1 %v3959_v0  ;;  %1139 = vmatprep.mubr.bf16.mxu0 %v3959_v0 }
  0xe5   : > { %947 = vmatmul.mubr.bf16.gmra.mrb[52].mxu1 %v340_v20  ;;  %1140 = vmatmul.mubr.bf16.gmra.mrb[52].mxu0 %v340_v20 }
  0xe6   : > { %956 = vmatprep.mubr.bf16.mxu1 %v3959_v0  ;;  %1149 = vmatprep.mubr.bf16.mxu0 %v3959_v0 }
  0xed   : > { %957 = vmatmul.mubr.bf16.gmra.mrb[56].mxu1 %v341_v28  ;;  %1150 = vmatmul.mubr.bf16.gmra.mrb[56].mxu0 %v341_v28 }
  0xee   : > { %966 = vmatprep.mubr.bf16.mxu1 %v3959_v0  ;;  %1159 = vmatprep.mubr.bf16.mxu0 %v3959_v0 }
  0xf5   : > { %967 = vmatmul.mubr.bf16.gmra.mrb[60].mxu1 %v342_v34  ;;  %1160 = vmatmul.mubr.bf16.gmra.mrb[60].mxu0 %v342_v34 }
  0xf6   : > { %976 = vmatprep.mubr.bf16.mxu1 %v3959_v0  ;;  %1169 = vmatprep.mubr.bf16.mxu0 %v3959_v0 }
  0xfd   : > { %977 = vmatmul.mubr.bf16.gmra.mrb[64].mxu1 %v4170_v24  ;;  %1170 = vmatmul.mubr.bf16.gmra.mrb[64].mxu0 %v4170_v24  ;;  %v4302_v24 = vshrl.u32 %v401_v23, 7 }
  0xfe   : > { %986 = vmatprep.mubr.bf16.mxu1 %v3959_v0  ;;  %1179 = vmatprep.mubr.bf16.mxu0 %v3959_v0 }
  0xff   : > { %v403_v36 = vsub.s32 0, %v4302_v24 }
 0x101   : > { %v4312_v39 = vrot.slane %v4308_v37, %v403_v36 }
 0x105   : > { %987 = vmatmul.mubr.bf16.gmra.mrb[68].mxu1 %v4182_v38  ;;  %1180 = vmatmul.mubr.bf16.gmra.mrb[68].mxu0 %v4182_v38  ;;  %v407_v38 = vsub.s32 1, %v4302_v24 }
 0x106   : > { %996 = vmatprep.mubr.bf16.mxu1 %v3959_v0  ;;  %1189 = vmatprep.mubr.bf16.mxu0 %v3959_v0 }
 0x107   : > { %v4315_v41 = vrot.slane %v4308_v37, %v407_v38 }
 0x10d   : > { %997 = vmatmul.mubr.bf16.gmra.mrb[72].mxu1 %v4194_v52  ;;  %1190 = vmatmul.mubr.bf16.gmra.mrb[72].mxu0 %v4194_v52 }
 0x10e   : > { %1006 = vmatprep.mubr.bf16.mxu1 %v3959_v0  ;;  %1199 = vmatprep.mubr.bf16.mxu0 %v3959_v0 }
 0x115   : > { %1007 = vmatmul.mubr.bf16.gmra.mrb[76].mxu1 %v4206_v3  ;;  %1200 = vmatmul.mubr.bf16.gmra.mrb[76].mxu0 %v4206_v3 }
 0x116   : > { %1016 = vmatprep.mubr.bf16.mxu1 %v3959_v0  ;;  %1209 = vmatprep.mubr.bf16.mxu0 %v3959_v0 }
 0x11d   : > { %1017 = vmatmul.mubr.bf16.gmra.mrb[80].mxu1 %v4216_v15  ;;  %1210 = vmatmul.mubr.bf16.gmra.mrb[80].mxu0 %v4216_v15 }
 0x11e   : > { %1026 = vmatprep.mubr.bf16.mxu1 %v3959_v0  ;;  %1219 = vmatprep.mubr.bf16.mxu0 %v3959_v0 }
 0x125   : > { %1027 = vmatmul.mubr.bf16.gmra.mrb[84].mxu1 %v4225_v21  ;;  %1220 = vmatmul.mubr.bf16.gmra.mrb[84].mxu0 %v4225_v21 }
 0x126   : > { %1036 = vmatprep.mubr.bf16.mxu1 %v3959_v0  ;;  %1229 = vmatprep.mubr.bf16.mxu0 %v3959_v0 }
 0x12d   : > { %1037 = vmatmul.mubr.bf16.gmra.mrb[88].mxu1 %v4234_v29  ;;  %1230 = vmatmul.mubr.bf16.gmra.mrb[88].mxu0 %v4234_v29 }
 0x12e   : > { %1046 = vmatprep.mubr.bf16.mxu1 %v3959_v0  ;;  %1239 = vmatprep.mubr.bf16.mxu0 %v3959_v0 }
 0x135   : > { %1047 = vmatmul.mubr.bf16.gmra.mrb[92].mxu1 %v4243_v35  ;;  %1240 = vmatmul.mubr.bf16.gmra.mrb[92].mxu0 %v4243_v35 }
 0x150   : > { %v705_v0 = vpop.f32.mrb[0].mxu0  ;;  %v785_v40 = vpop.f32.mrb[0].mxu1 }
 0x151   : > { %v706_v42 = vadd.f32 %v705_v0, %v4312_v39  ;;  %v707_v43 = vpop.f32.mrb[1].mxu0  ;;  %v787_v44 = vpop.f32.mrb[1].mxu1  ;;  %v786_v47 = vadd.f32 %v785_v40, %v4312_v39 }
 0x152   : > { %v709_v45 = vpop.f32.mrb[2].mxu0  ;;  %v789_v46 = vpop.f32.mrb[2].mxu1  ;;  %v708_v52 = vadd.f32 %v707_v43, %v4315_v41  ;;  %v788_v53 = vadd.f32 %v787_v44, %v4315_v41 }
 0x153   : > { %v710_v48 = vadd.f32 %v709_v45, %v4312_v39  ;;  %v790_v49 = vadd.f32 %v789_v46, %v4312_v39  ;;  %v711_v50 = vpop.f32.mrb[3].mxu0  ;;  %v791_v51 = vpop.f32.mrb[3].mxu1 }
 0x154   : > { %v712_v54 = vadd.f32 %v711_v50, %v4315_v41  ;;  %v792_v55 = vadd.f32 %v791_v51, %v4315_v41 }
 0x155   : > { %v2999_v56 = vpack.c.bf16 %v710_v48, %v706_v42  ;;  %v3039_v57 = vpack.c.bf16 %v790_v49, %v786_v47 }
 0x156   : > { %v3079_v58 = vpack.c.bf16 %v712_v54, %v708_v52  ;;  %v3119_v59 = vpack.c.bf16 %v792_v55, %v788_v53 }
 0x157   : > { %3000 = vst [vmem:[%s4326_s17] sm:$0xff] %v2999_v56   ;;  %3483 = vst [vmem:[%s4326_s17 + $0x40] sm:$0xff] %v3039_v57  }
 0x158   : > { %3491 = vst [vmem:[%s4326_s17 + $0x80] sm:$0xff] %v3079_v58   ;;  %3499 = vst [vmem:[%s4326_s17 + $0xc0] sm:$0xff] %v3119_v59   ;;  %v715_v60 = vpop.f32.mrb[4].mxu0  ;;  %v795_v61 = vpop.f32.mrb[4].mxu1 }
 0x159   : > { %v716_v62 = vadd.f32 %v715_v60, %v4312_v39  ;;  %v717_v63 = vpop.f32.mrb[5].mxu0  ;;  %v797_v1 = vpop.f32.mrb[5].mxu1  ;;  %v796_v4 = vadd.f32 %v795_v61, %v4312_v39 }
 0x15a   : > { %v719_v2 = vpop.f32.mrb[6].mxu0  ;;  %v799_v3 = vpop.f32.mrb[6].mxu1  ;;  %v718_v9 = vadd.f32 %v717_v63, %v4315_v41  ;;  %v798_v10 = vadd.f32 %v797_v1, %v4315_v41 }
 0x15b   : > { %v720_v5 = vadd.f32 %v719_v2, %v4312_v39  ;;  %v800_v6 = vadd.f32 %v799_v3, %v4312_v39  ;;  %v721_v7 = vpop.f32.mrb[7].mxu0  ;;  %v801_v8 = vpop.f32.mrb[7].mxu1 }
 0x15c   : > { %v722_v11 = vadd.f32 %v721_v7, %v4315_v41  ;;  %v802_v12 = vadd.f32 %v801_v8, %v4315_v41 }
 0x15d   : > { %v3004_v13 = vpack.c.bf16 %v720_v5, %v716_v62  ;;  %v3044_v14 = vpack.c.bf16 %v800_v6, %v796_v4 }
 0x15e   : > { %v3084_v15 = vpack.c.bf16 %v722_v11, %v718_v9  ;;  %v3124_v16 = vpack.c.bf16 %v802_v12, %v798_v10 }
 0x15f   : > { %3476 = vst [vmem:[%s4326_s17 + $0x8] sm:$0xff] %v3004_v13   ;;  %3484 = vst [vmem:[%s4326_s17 + $0x48] sm:$0xff] %v3044_v14  }
 0x160   : > { %3492 = vst [vmem:[%s4326_s17 + $0x88] sm:$0xff] %v3084_v15   ;;  %3500 = vst [vmem:[%s4326_s17 + $0xc8] sm:$0xff] %v3124_v16   ;;  %v725_v17 = vpop.f32.mrb[8].mxu0  ;;  %v805_v18 = vpop.f32.mrb[8].mxu1 }
 0x161   : > { %v726_v19 = vadd.f32 %v725_v17, %v4312_v39  ;;  %v727_v20 = vpop.f32.mrb[9].mxu0  ;;  %v807_v21 = vpop.f32.mrb[9].mxu1  ;;  %v806_v26 = vadd.f32 %v805_v18, %v4312_v39 }
 0x162   : > { %v729_v22 = vpop.f32.mrb[10].mxu0  ;;  %v809_v25 = vpop.f32.mrb[10].mxu1  ;;  %v728_v31 = vadd.f32 %v727_v20, %v4315_v41  ;;  %v808_v32 = vadd.f32 %v807_v21, %v4315_v41 }
 0x163   : > { %v730_v27 = vadd.f32 %v729_v22, %v4312_v39  ;;  %v810_v28 = vadd.f32 %v809_v25, %v4312_v39  ;;  %v731_v29 = vpop.f32.mrb[11].mxu0  ;;  %v811_v30 = vpop.f32.mrb[11].mxu1 }
 0x164   : > { %v732_v33 = vadd.f32 %v731_v29, %v4315_v41  ;;  %v812_v34 = vadd.f32 %v811_v30, %v4315_v41 }
 0x165   : > { %v3009_v35 = vpack.c.bf16 %v730_v27, %v726_v19  ;;  %v3049_v23 = vpack.c.bf16 %v810_v28, %v806_v26 }
 0x166   : > { %v3089_v36 = vpack.c.bf16 %v732_v33, %v728_v31  ;;  %v3129_v38 = vpack.c.bf16 %v812_v34, %v808_v32 }
 0x167   : > { %3477 = vst [vmem:[%s4326_s17 + $0x10] sm:$0xff] %v3009_v35   ;;  %3485 = vst [vmem:[%s4326_s17 + $0x50] sm:$0xff] %v3049_v23  }
 0x168   : > { %3493 = vst [vmem:[%s4326_s17 + $0x90] sm:$0xff] %v3089_v36   ;;  %3501 = vst [vmem:[%s4326_s17 + $0xd0] sm:$0xff] %v3129_v38   ;;  %v735_v0 = vpop.f32.mrb[12].mxu0  ;;  %v815_v40 = vpop.f32.mrb[12].mxu1 }
 0x169   : > { %v736_v42 = vadd.f32 %v735_v0, %v4312_v39  ;;  %v737_v43 = vpop.f32.mrb[13].mxu0  ;;  %v817_v44 = vpop.f32.mrb[13].mxu1  ;;  %v816_v47 = vadd.f32 %v815_v40, %v4312_v39 }
 0x16a   : > { %v739_v45 = vpop.f32.mrb[14].mxu0  ;;  %v819_v46 = vpop.f32.mrb[14].mxu1  ;;  %v738_v52 = vadd.f32 %v737_v43, %v4315_v41  ;;  %v818_v53 = vadd.f32 %v817_v44, %v4315_v41 }
 0x16b   : > { %v740_v48 = vadd.f32 %v739_v45, %v4312_v39  ;;  %v820_v49 = vadd.f32 %v819_v46, %v4312_v39  ;;  %v741_v50 = vpop.f32.mrb[15].mxu0  ;;  %v821_v51 = vpop.f32.mrb[15].mxu1 }
 0x16c   : > { %v742_v54 = vadd.f32 %v741_v50, %v4315_v41  ;;  %v822_v55 = vadd.f32 %v821_v51, %v4315_v41 }
 0x16d   : > { %v3014_v56 = vpack.c.bf16 %v740_v48, %v736_v42  ;;  %v3054_v57 = vpack.c.bf16 %v820_v49, %v816_v47 }
 0x16e   : > { %v3094_v58 = vpack.c.bf16 %v742_v54, %v738_v52  ;;  %v3134_v59 = vpack.c.bf16 %v822_v55, %v818_v53 }
 0x16f   : > { %3478 = vst [vmem:[%s4326_s17 + $0x18] sm:$0xff] %v3014_v56   ;;  %3486 = vst [vmem:[%s4326_s17 + $0x58] sm:$0xff] %v3054_v57  }
 0x170   : > { %3494 = vst [vmem:[%s4326_s17 + $0x98] sm:$0xff] %v3094_v58   ;;  %3502 = vst [vmem:[%s4326_s17 + $0xd8] sm:$0xff] %v3134_v59   ;;  %v745_v60 = vpop.f32.mrb[16].mxu0  ;;  %v825_v61 = vpop.f32.mrb[16].mxu1 }
 0x171   : > { %v746_v62 = vadd.f32 %v745_v60, %v4312_v39  ;;  %v747_v63 = vpop.f32.mrb[17].mxu0  ;;  %v827_v1 = vpop.f32.mrb[17].mxu1  ;;  %v826_v4 = vadd.f32 %v825_v61, %v4312_v39 }
 0x172   : > { %v749_v2 = vpop.f32.mrb[18].mxu0  ;;  %v829_v3 = vpop.f32.mrb[18].mxu1  ;;  %v748_v9 = vadd.f32 %v747_v63, %v4315_v41  ;;  %v828_v10 = vadd.f32 %v827_v1, %v4315_v41 }
 0x173   : > { %v750_v5 = vadd.f32 %v749_v2, %v4312_v39  ;;  %v830_v6 = vadd.f32 %v829_v3, %v4312_v39  ;;  %v751_v7 = vpop.f32.mrb[19].mxu0  ;;  %v831_v8 = vpop.f32.mrb[19].mxu1  ;;  %v419_v2 = vsub.s32 4, %v4302_v24 }
 0x174   : > { %v752_v11 = vadd.f32 %v751_v7, %v4315_v41  ;;  %v832_v12 = vadd.f32 %v831_v8, %v4315_v41 }
 0x175   : > { %v3019_v13 = vpack.c.bf16 %v750_v5, %v746_v62  ;;  %v3059_v14 = vpack.c.bf16 %v830_v6, %v826_v4  ;;  %v411_v5 = vsub.s32 2, %v4302_v24  ;;  %v415_v6 = vsub.s32 3, %v4302_v24 }
 0x176   : > { %v3099_v15 = vpack.c.bf16 %v752_v11, %v748_v9  ;;  %v3139_v16 = vpack.c.bf16 %v832_v12, %v828_v10  ;;  %v423_v12 = vsub.s32 5, %v4302_v24 }
 0x177   : > { %3479 = vst [vmem:[%s4326_s17 + $0x20] sm:$0xff] %v3019_v13   ;;  %3487 = vst [vmem:[%s4326_s17 + $0x60] sm:$0xff] %v3059_v14   ;;  %v4422_v24 = vrot.slane %v4308_v37, %v411_v5 }
 0x178   : > { %3495 = vst [vmem:[%s4326_s17 + $0xa0] sm:$0xff] %v3099_v15   ;;  %3503 = vst [vmem:[%s4326_s17 + $0xe0] sm:$0xff] %v3139_v16   ;;  %v755_v17 = vpop.f32.mrb[20].mxu0  ;;  %v835_v18 = vpop.f32.mrb[20].mxu1 }
 0x179   : > { %v756_v19 = vadd.f32 %v755_v17, %v4312_v39  ;;  %v757_v20 = vpop.f32.mrb[21].mxu0  ;;  %v837_v21 = vpop.f32.mrb[21].mxu1  ;;  %v836_v26 = vadd.f32 %v835_v18, %v4312_v39 }
 0x17a   : > { %v759_v22 = vpop.f32.mrb[22].mxu0  ;;  %v839_v25 = vpop.f32.mrb[22].mxu1  ;;  %v758_v31 = vadd.f32 %v757_v20, %v4315_v41  ;;  %v838_v32 = vadd.f32 %v837_v21, %v4315_v41 }
 0x17b   : > { %v760_v27 = vadd.f32 %v759_v22, %v4312_v39  ;;  %v840_v28 = vadd.f32 %v839_v25, %v4312_v39  ;;  %v761_v29 = vpop.f32.mrb[23].mxu0  ;;  %v841_v30 = vpop.f32.mrb[23].mxu1  ;;  %v4427_v25 = vrot.slane %v4308_v37, %v415_v6 }
 0x17c   : > { %v762_v33 = vadd.f32 %v761_v29, %v4315_v41  ;;  %v842_v34 = vadd.f32 %v841_v30, %v4315_v41 }
 0x17d   : > { %v3024_v35 = vpack.c.bf16 %v760_v27, %v756_v19  ;;  %v3064_v23 = vpack.c.bf16 %v840_v28, %v836_v26  ;;  %v4417_v19 = vrot.slane %v4308_v37, %v419_v2 }
 0x17e   : > { %v3104_v36 = vpack.c.bf16 %v762_v33, %v758_v31  ;;  %v3144_v38 = vpack.c.bf16 %v842_v34, %v838_v32 }
 0x17f   : > { %3480 = vst [vmem:[%s4326_s17 + $0x28] sm:$0xff] %v3024_v35   ;;  %3488 = vst [vmem:[%s4326_s17 + $0x68] sm:$0xff] %v3064_v23  }
 0x180   : > { %3496 = vst [vmem:[%s4326_s17 + $0xa8] sm:$0xff] %v3104_v36   ;;  %3504 = vst [vmem:[%s4326_s17 + $0xe8] sm:$0xff] %v3144_v38   ;;  %v765_v0 = vpop.f32.mrb[24].mxu0  ;;  %v845_v40 = vpop.f32.mrb[24].mxu1 }
 0x181   : > { %v766_v42 = vadd.f32 %v765_v0, %v4312_v39  ;;  %v767_v43 = vpop.f32.mrb[25].mxu0  ;;  %v847_v44 = vpop.f32.mrb[25].mxu1  ;;  %v846_v47 = vadd.f32 %v845_v40, %v4312_v39 }
 0x182   : > { %v769_v45 = vpop.f32.mrb[26].mxu0  ;;  %v849_v46 = vpop.f32.mrb[26].mxu1  ;;  %v768_v52 = vadd.f32 %v767_v43, %v4315_v41  ;;  %v848_v53 = vadd.f32 %v847_v44, %v4315_v41 }
 0x183   : > { %v770_v48 = vadd.f32 %v769_v45, %v4312_v39  ;;  %v850_v49 = vadd.f32 %v849_v46, %v4312_v39  ;;  %v771_v50 = vpop.f32.mrb[27].mxu0  ;;  %v851_v51 = vpop.f32.mrb[27].mxu1 }
 0x184   : > { %v772_v54 = vadd.f32 %v771_v50, %v4315_v41  ;;  %v852_v55 = vadd.f32 %v851_v51, %v4315_v41 }
 0x185   : > { %v3029_v56 = vpack.c.bf16 %v770_v48, %v766_v42  ;;  %v3069_v57 = vpack.c.bf16 %v850_v49, %v846_v47 }
 0x186   : > { %v3109_v58 = vpack.c.bf16 %v772_v54, %v768_v52  ;;  %v3149_v59 = vpack.c.bf16 %v852_v55, %v848_v53 }
 0x187   : > { %3481 = vst [vmem:[%s4326_s17 + $0x30] sm:$0xff] %v3029_v56   ;;  %3489 = vst [vmem:[%s4326_s17 + $0x70] sm:$0xff] %v3069_v57  }
 0x188   : > { %3497 = vst [vmem:[%s4326_s17 + $0xb0] sm:$0xff] %v3109_v58   ;;  %3505 = vst [vmem:[%s4326_s17 + $0xf0] sm:$0xff] %v3149_v59   ;;  %v775_v60 = vpop.f32.mrb[28].mxu0  ;;  %v855_v61 = vpop.f32.mrb[28].mxu1 }
 0x189   : > { %v776_v62 = vadd.f32 %v775_v60, %v4312_v39  ;;  %v777_v63 = vpop.f32.mrb[29].mxu0  ;;  %v857_v1 = vpop.f32.mrb[29].mxu1  ;;  %v856_v7 = vadd.f32 %v855_v61, %v4312_v39 }
 0x18a   : > { %v779_v3 = vpop.f32.mrb[30].mxu0  ;;  %v859_v4 = vpop.f32.mrb[30].mxu1  ;;  %v778_v13 = vadd.f32 %v777_v63, %v4315_v41  ;;  %v858_v14 = vadd.f32 %v857_v1, %v4315_v41 }
 0x18b   : > { %v780_v8 = vadd.f32 %v779_v3, %v4312_v39  ;;  %v860_v9 = vadd.f32 %v859_v4, %v4312_v39  ;;  %v781_v10 = vpop.f32.mrb[31].mxu0  ;;  %v861_v11 = vpop.f32.mrb[31].mxu1 }
 0x18c   : > { %v782_v15 = vadd.f32 %v781_v10, %v4315_v41  ;;  %v862_v16 = vadd.f32 %v861_v11, %v4315_v41  ;;  %v4430_v41 = vrot.slane %v4308_v37, %v423_v12 }
 0x18d   : > { %v3034_v17 = vpack.c.bf16 %v780_v8, %v776_v62  ;;  %v3074_v18 = vpack.c.bf16 %v860_v9, %v856_v7 }
 0x18e   : > { %v3114_v39 = vpack.c.bf16 %v782_v15, %v778_v13  ;;  %v3154_v20 = vpack.c.bf16 %v862_v16, %v858_v14 }
 0x18f   : > { %3482 = vst [vmem:[%s4326_s17 + $0x38] sm:$0xff] %v3034_v17   ;;  %3490 = vst [vmem:[%s4326_s17 + $0x78] sm:$0xff] %v3074_v18  }
 0x190   : > { %3498 = vst [vmem:[%s4326_s17 + $0xb8] sm:$0xff] %v3114_v39   ;;  %3506 = vst [vmem:[%s4326_s17 + $0xf8] sm:$0xff] %v3154_v20   ;;  %v898_v21 = vpop.f32.mrb[32].mxu1  ;;  %v1091_v22 = vpop.f32.mrb[32].mxu0 }
 0x191   : > { %v1092_v26 = vadd.f32 %v1091_v22, %v4417_v19  ;;  %v900_v27 = vpop.f32.mrb[33].mxu1  ;;  %v1093_v28 = vpop.f32.mrb[33].mxu0  ;;  %v899_v31 = vadd.f32 %v898_v21, %v4422_v24 }
 0x192   : > { %v902_v29 = vpop.f32.mrb[34].mxu1  ;;  %v1095_v30 = vpop.f32.mrb[34].mxu0  ;;  %v901_v35 = vadd.f32 %v900_v27, %v4427_v25  ;;  %v1094_v23 = vadd.f32 %v1093_v28, %v4430_v41 }
 0x193   : > { %v903_v32 = vadd.f32 %v902_v29, %v4422_v24  ;;  %v1096_v33 = vadd.f32 %v1095_v30, %v4417_v19  ;;  %v904_v34 = vpop.f32.mrb[35].mxu1  ;;  %v1097_v37 = vpop.f32.mrb[35].mxu0 }
 0x194   : > { %v905_v36 = vadd.f32 %v904_v34, %v4427_v25  ;;  %v1098_v38 = vadd.f32 %v1097_v37, %v4430_v41 }
 0x195   : > { %v3159_v0 = vpack.c.bf16 %v903_v32, %v899_v31  ;;  %v3319_v40 = vpack.c.bf16 %v1096_v33, %v1092_v26 }
 0x196   : > { %v3239_v42 = vpack.c.bf16 %v905_v36, %v901_v35  ;;  %v3399_v43 = vpack.c.bf16 %v1098_v38, %v1094_v23 }
 0x197   : > { %3818 = shalt.err (!%p3815_p9)
}
 0x198   : > { %s3819_s28 = scalar_lea.hbm %s4447_s9, 4096  ;;  %s3823_s6 = scalar_lea.hbm %s4768_s3, 8192 }
 0x199   : > { %p3820_p1 = scmp.ne.s32.totalorder %s4447_s9, %s3819_s28  ;;  %p3824_p7 = scmp.lt.u32.totalorder %s4447_s9, %s4768_s3 }
 0x19a   : > { %p3825_p13 = scmp.lt.u32.totalorder %s3823_s6, %s3819_s28  ;;  %p3827_p6 = scmp.lt.u32.totalorder %s3819_s28, %s4447_s9 }
 0x19b   : > { %p3821_p2 = pnand %p3820_p1, %p4089_p10 }
 0x19c   : > { %p3826_p4 = por %p3825_p13, %p3824_p7 }
 0x19d   : > { %p3822_p3 = pneg %p3821_p2 }
 0x19e   : > { %p3828_p8 = por %p3827_p6, %p3826_p4 }
 0x1a0   : > { %p3829_p12 = pnand %p3828_p8, %p3822_p3 }
 0x1a2   : > { %3832 = shalt.err (!%p3829_p12)
}
 0x1a3   : > { %s4775_s10 = smov 64   ;;  %s3962_s26 = smov 4   ;;  %v908_v44 = vpop.f32.mrb[36].mxu1  ;;  %v1101_v45 = vpop.f32.mrb[36].mxu0 }
 0x1a4   : > { %3591 = dma.vmem_to_hbm [thread:$0]  (%p4089_p10), %s4450_s16, 4096, %s4447_s9, %s2214_s15, %s4775_s10, %s4775_s10, %s3962_s26   ;;  %v1102_v46 = vadd.f32 %v1101_v45, %v4417_v19  ;;  %v910_v47 = vpop.f32.mrb[37].mxu1  ;;  %v1103_v48 = vpop.f32.mrb[37].mxu0  ;;  %v909_v51 = vadd.f32 %v908_v44, %v4422_v24 }
 0x1a5   : > { %s4480_s17 = scalar_lea.vmem [#allocation8], %s4148_s30  ;;  %s4484_s28 = scalar_lea.vmem [#allocation10], %s4148_s30  ;;  %v912_v49 = vpop.f32.mrb[38].mxu1  ;;  %v1105_v50 = vpop.f32.mrb[38].mxu0  ;;  %v911_v56 = vadd.f32 %v910_v47, %v4427_v25  ;;  %v1104_v57 = vadd.f32 %v1103_v48, %v4430_v41 }
 0x1a6   : > { %3160 = vst [vmem:[%s4480_s17] sm:$0xff] %v3159_v0   ;;  %3320 = vst [vmem:[%s4484_s28] sm:$0xff] %v3319_v40   ;;  %v913_v52 = vadd.f32 %v912_v49, %v4422_v24  ;;  %v1106_v53 = vadd.f32 %v1105_v50, %v4417_v19  ;;  %v914_v54 = vpop.f32.mrb[39].mxu1  ;;  %v1107_v55 = vpop.f32.mrb[39].mxu0  ;;  %s2218_s29 = sand.u32 1, %s4026_s24   ;;  %s2257_s30 = sshll.u32 %s4480_s17, 4  ;;  %s4674_s30 = int_to_ptr.vmem [resolvable:$true] %s2257_s30 }
 0x1a7   : > { %3522 = vst [vmem:[%s4480_s17 + $0x80] sm:$0xff] %v3239_v42   ;;  %3553 = vst [vmem:[%s4484_s28 + $0x80] sm:$0xff] %v3399_v43   ;;  %v915_v58 = vadd.f32 %v914_v54, %v4427_v25  ;;  %v1108_v59 = vadd.f32 %v1107_v55, %v4430_v41  ;;  %v918_v1 = vpop.f32.mrb[40].mxu1  ;;  %v1111_v2 = vpop.f32.mrb[40].mxu0  ;;  %s2275_s24 = sshll.u32 %s4484_s28, 4  ;;  %s4672_s15 = scalar_lea.hbm %s4769_s4, %s4434_s8  ;;  %s4684_s24 = int_to_ptr.vmem [resolvable:$true] %s2275_s24 }
 0x1a8   : > { %v3164_v60 = vpack.c.bf16 %v913_v52, %v909_v51  ;;  %v3324_v61 = vpack.c.bf16 %v1106_v53, %v1102_v46  ;;  %v1112_v3 = vadd.f32 %v1111_v2, %v4417_v19  ;;  %v920_v4 = vpop.f32.mrb[41].mxu1  ;;  %v1113_v5 = vpop.f32.mrb[41].mxu0  ;;  %v919_v8 = vadd.f32 %v918_v1, %v4422_v24  ;;  %s4682_s12 = scalar_lea.hbm %s4770_s5, %s4434_s8  ;;  %s4688_s14 = scalar_lea.sflag [#allocation9], %s2218_s29 }
 0x1a9   : > { %v3244_v62 = vpack.c.bf16 %v915_v58, %v911_v56  ;;  %v3404_v63 = vpack.c.bf16 %v1108_v59, %v1104_v57  ;;  %v922_v6 = vpop.f32.mrb[42].mxu1  ;;  %v1115_v7 = vpop.f32.mrb[42].mxu0  ;;  %v921_v13 = vadd.f32 %v920_v4, %v4427_v25  ;;  %v1114_v14 = vadd.f32 %v1113_v5, %v4430_v41  ;;  %s3833_s9 = scalar_lea.vmem %s4674_s30, 4096  ;;  %s3963_s16 = smov [#allocation8]  }
 0x1aa   : > { %3507 = vst [vmem:[%s4480_s17 + $0x8] sm:$0xff] %v3164_v60   ;;  %3538 = vst [vmem:[%s4484_s28 + $0x8] sm:$0xff] %v3324_v61   ;;  %v923_v9 = vadd.f32 %v922_v6, %v4422_v24  ;;  %v1116_v10 = vadd.f32 %v1115_v7, %v4417_v19  ;;  %v924_v11 = vpop.f32.mrb[43].mxu1  ;;  %v1117_v12 = vpop.f32.mrb[43].mxu0  ;;  %p3834_p11 = scmp.ne.s32.totalorder %s4674_s30, %s3833_s9  ;;  %s3837_s25 = sshll.u32 %s3963_s16, 4  ;;  %s3838_s25 = int_to_ptr.vmem [resolvable:$false] %s3837_s25 }
 0x1ab   : > { %3523 = vst [vmem:[%s4480_s17 + $0x88] sm:$0xff] %v3244_v62   ;;  %3554 = vst [vmem:[%s4484_s28 + $0x88] sm:$0xff] %v3404_v63   ;;  %v925_v15 = vadd.f32 %v924_v11, %v4427_v25  ;;  %v1118_v16 = vadd.f32 %v1117_v12, %v4430_v41  ;;  %v928_v21 = vpop.f32.mrb[44].mxu1  ;;  %v1121_v22 = vpop.f32.mrb[44].mxu0  ;;  %s3839_s10 = scalar_lea.vmem %s3838_s25, 8192  ;;  %p3840_p9 = scmp.lt.s32.totalorder %s4674_s30, %s3838_s25 }
 0x1ac   : > { %v3169_v17 = vpack.c.bf16 %v923_v9, %v919_v8  ;;  %v3329_v18 = vpack.c.bf16 %v1116_v10, %v1112_v3  ;;  %v1122_v26 = vadd.f32 %v1121_v22, %v4417_v19  ;;  %v930_v27 = vpop.f32.mrb[45].mxu1  ;;  %v1123_v28 = vpop.f32.mrb[45].mxu0  ;;  %v929_v31 = vadd.f32 %v928_v21, %v4422_v24  ;;  %p3835_p0 = pnand %p3834_p11, %p4089_p10  ;;  %p3841_p1 = scmp.lt.s32.totalorder %s3839_s10, %s3833_s9 }
 0x1ad   : > { %v3249_v39 = vpack.c.bf16 %v925_v15, %v921_v13  ;;  %v3409_v20 = vpack.c.bf16 %v1118_v16, %v1114_v14  ;;  %v932_v29 = vpop.f32.mrb[46].mxu1  ;;  %v1125_v30 = vpop.f32.mrb[46].mxu0  ;;  %v931_v35 = vadd.f32 %v930_v27, %v4427_v25  ;;  %v1124_v23 = vadd.f32 %v1123_v28, %v4430_v41 }
 0x1ae   : > { %3508 = vst [vmem:[%s4480_s17 + $0x10] sm:$0xff] %v3169_v17   ;;  %3539 = vst [vmem:[%s4484_s28 + $0x10] sm:$0xff] %v3329_v18   ;;  %v933_v32 = vadd.f32 %v932_v29, %v4422_v24  ;;  %v1126_v33 = vadd.f32 %v1125_v30, %v4417_v19  ;;  %v934_v34 = vpop.f32.mrb[47].mxu1  ;;  %v1127_v37 = vpop.f32.mrb[47].mxu0  ;;  %p3836_p5 = pneg %p3835_p0  ;;  %p3842_p2 = por %p3841_p1, %p3840_p9 }
 0x1af   : > { %3524 = vst [vmem:[%s4480_s17 + $0x90] sm:$0xff] %v3249_v39   ;;  %3555 = vst [vmem:[%s4484_s28 + $0x90] sm:$0xff] %v3409_v20   ;;  %v935_v36 = vadd.f32 %v934_v34, %v4427_v25  ;;  %v1128_v38 = vadd.f32 %v1127_v37, %v4430_v41 }
 0x1b0   : > { %v3174_v0 = vpack.c.bf16 %v933_v32, %v929_v31  ;;  %v3334_v40 = vpack.c.bf16 %v1126_v33, %v1122_v26  ;;  %v938_v44 = vpop.f32.mrb[48].mxu1  ;;  %v1131_v45 = vpop.f32.mrb[48].mxu0  ;;  %p3843_p3 = pnand %p3842_p2, %p3836_p5 }
 0x1b1   : > { %v3254_v42 = vpack.c.bf16 %v935_v36, %v931_v35  ;;  %v3414_v43 = vpack.c.bf16 %v1128_v38, %v1124_v23  ;;  %v1132_v46 = vadd.f32 %v1131_v45, %v4417_v19  ;;  %v940_v47 = vpop.f32.mrb[49].mxu1  ;;  %v1133_v48 = vpop.f32.mrb[49].mxu0  ;;  %v939_v51 = vadd.f32 %v938_v44, %v4422_v24 }
 0x1b2   : > { %3509 = vst [vmem:[%s4480_s17 + $0x18] sm:$0xff] %v3174_v0   ;;  %3540 = vst [vmem:[%s4484_s28 + $0x18] sm:$0xff] %v3334_v40   ;;  %v942_v49 = vpop.f32.mrb[50].mxu1  ;;  %v1135_v50 = vpop.f32.mrb[50].mxu0  ;;  %v941_v56 = vadd.f32 %v940_v47, %v4427_v25  ;;  %v1134_v57 = vadd.f32 %v1133_v48, %v4430_v41 }
 0x1b3   : > { %3525 = vst [vmem:[%s4480_s17 + $0x98] sm:$0xff] %v3254_v42   ;;  %3556 = vst [vmem:[%s4484_s28 + $0x98] sm:$0xff] %v3414_v43   ;;  %v943_v52 = vadd.f32 %v942_v49, %v4422_v24  ;;  %v1136_v53 = vadd.f32 %v1135_v50, %v4417_v19  ;;  %v944_v54 = vpop.f32.mrb[51].mxu1  ;;  %v1137_v55 = vpop.f32.mrb[51].mxu0 }
 0x1b4   : > { %v945_v58 = vadd.f32 %v944_v54, %v4427_v25  ;;  %v1138_v59 = vadd.f32 %v1137_v55, %v4430_v41 }
 0x1b5   : > { %v3179_v60 = vpack.c.bf16 %v943_v52, %v939_v51  ;;  %v3339_v61 = vpack.c.bf16 %v1136_v53, %v1132_v46 }
 0x1b6   : > { %v3259_v62 = vpack.c.bf16 %v945_v58, %v941_v56  ;;  %v3419_v63 = vpack.c.bf16 %v1138_v59, %v1134_v57 }
 0x1b7   : > { %3510 = vst [vmem:[%s4480_s17 + $0x20] sm:$0xff] %v3179_v60   ;;  %3541 = vst [vmem:[%s4484_s28 + $0x20] sm:$0xff] %v3339_v61  }
 0x1b8   : > { %3526 = vst [vmem:[%s4480_s17 + $0xa0] sm:$0xff] %v3259_v62   ;;  %3557 = vst [vmem:[%s4484_s28 + $0xa0] sm:$0xff] %v3419_v63   ;;  %v948_v1 = vpop.f32.mrb[52].mxu1  ;;  %v1141_v2 = vpop.f32.mrb[52].mxu0 }
 0x1b9   : > { %v1142_v3 = vadd.f32 %v1141_v2, %v4417_v19  ;;  %v950_v4 = vpop.f32.mrb[53].mxu1  ;;  %v1143_v5 = vpop.f32.mrb[53].mxu0  ;;  %v949_v8 = vadd.f32 %v948_v1, %v4422_v24 }
 0x1ba   : > { %v952_v6 = vpop.f32.mrb[54].mxu1  ;;  %v1145_v7 = vpop.f32.mrb[54].mxu0  ;;  %v951_v13 = vadd.f32 %v950_v4, %v4427_v25  ;;  %v1144_v14 = vadd.f32 %v1143_v5, %v4430_v41 }
 0x1bb   : > { %v953_v9 = vadd.f32 %v952_v6, %v4422_v24  ;;  %v1146_v10 = vadd.f32 %v1145_v7, %v4417_v19  ;;  %v954_v11 = vpop.f32.mrb[55].mxu1  ;;  %v1147_v12 = vpop.f32.mrb[55].mxu0 }
 0x1bc   : > { %v955_v15 = vadd.f32 %v954_v11, %v4427_v25  ;;  %v1148_v16 = vadd.f32 %v1147_v12, %v4430_v41 }
 0x1bd   : > { %v3184_v17 = vpack.c.bf16 %v953_v9, %v949_v8  ;;  %v3344_v18 = vpack.c.bf16 %v1146_v10, %v1142_v3 }
 0x1be   : > { %v3264_v39 = vpack.c.bf16 %v955_v15, %v951_v13  ;;  %v3424_v20 = vpack.c.bf16 %v1148_v16, %v1144_v14 }
 0x1bf   : > { %3511 = vst [vmem:[%s4480_s17 + $0x28] sm:$0xff] %v3184_v17   ;;  %3542 = vst [vmem:[%s4484_s28 + $0x28] sm:$0xff] %v3344_v18  }
 0x1c0   : > { %3527 = vst [vmem:[%s4480_s17 + $0xa8] sm:$0xff] %v3264_v39   ;;  %3558 = vst [vmem:[%s4484_s28 + $0xa8] sm:$0xff] %v3424_v20   ;;  %v958_v21 = vpop.f32.mrb[56].mxu1  ;;  %v1151_v22 = vpop.f32.mrb[56].mxu0 }
 0x1c1   : > { %v1152_v26 = vadd.f32 %v1151_v22, %v4417_v19  ;;  %v960_v27 = vpop.f32.mrb[57].mxu1  ;;  %v1153_v28 = vpop.f32.mrb[57].mxu0  ;;  %v959_v31 = vadd.f32 %v958_v21, %v4422_v24 }
 0x1c2   : > { %v962_v29 = vpop.f32.mrb[58].mxu1  ;;  %v1155_v30 = vpop.f32.mrb[58].mxu0  ;;  %v961_v35 = vadd.f32 %v960_v27, %v4427_v25  ;;  %v1154_v23 = vadd.f32 %v1153_v28, %v4430_v41 }
 0x1c3   : > { %v963_v32 = vadd.f32 %v962_v29, %v4422_v24  ;;  %v1156_v33 = vadd.f32 %v1155_v30, %v4417_v19  ;;  %v964_v34 = vpop.f32.mrb[59].mxu1  ;;  %v1157_v37 = vpop.f32.mrb[59].mxu0 }
 0x1c4   : > { %v965_v36 = vadd.f32 %v964_v34, %v4427_v25  ;;  %v1158_v38 = vadd.f32 %v1157_v37, %v4430_v41 }
 0x1c5   : > { %v3189_v0 = vpack.c.bf16 %v963_v32, %v959_v31  ;;  %v3349_v40 = vpack.c.bf16 %v1156_v33, %v1152_v26 }
 0x1c6   : > { %v3269_v42 = vpack.c.bf16 %v965_v36, %v961_v35  ;;  %v3429_v43 = vpack.c.bf16 %v1158_v38, %v1154_v23 }
 0x1c7   : > { %3512 = vst [vmem:[%s4480_s17 + $0x30] sm:$0xff] %v3189_v0   ;;  %3543 = vst [vmem:[%s4484_s28 + $0x30] sm:$0xff] %v3349_v40  }
 0x1c8   : > { %3528 = vst [vmem:[%s4480_s17 + $0xb0] sm:$0xff] %v3269_v42   ;;  %3559 = vst [vmem:[%s4484_s28 + $0xb0] sm:$0xff] %v3429_v43   ;;  %v968_v44 = vpop.f32.mrb[60].mxu1  ;;  %v1161_v45 = vpop.f32.mrb[60].mxu0 }
 0x1c9   : > { %v1162_v46 = vadd.f32 %v1161_v45, %v4417_v19  ;;  %v970_v47 = vpop.f32.mrb[61].mxu1  ;;  %v1163_v48 = vpop.f32.mrb[61].mxu0  ;;  %v969_v51 = vadd.f32 %v968_v44, %v4422_v24 }
 0x1ca   : > { %v972_v49 = vpop.f32.mrb[62].mxu1  ;;  %v1165_v50 = vpop.f32.mrb[62].mxu0  ;;  %v971_v56 = vadd.f32 %v970_v47, %v4427_v25  ;;  %v1164_v57 = vadd.f32 %v1163_v48, %v4430_v41 }
 0x1cb   : > { %v973_v52 = vadd.f32 %v972_v49, %v4422_v24  ;;  %v1166_v53 = vadd.f32 %v1165_v50, %v4417_v19  ;;  %v974_v54 = vpop.f32.mrb[63].mxu1  ;;  %v1167_v55 = vpop.f32.mrb[63].mxu0 }
 0x1cc   : > { %v975_v58 = vadd.f32 %v974_v54, %v4427_v25  ;;  %v1168_v59 = vadd.f32 %v1167_v55, %v4430_v41 }
 0x1cd   : > { %v3194_v60 = vpack.c.bf16 %v973_v52, %v969_v51  ;;  %v3354_v61 = vpack.c.bf16 %v1166_v53, %v1162_v46 }
 0x1ce   : > { %v3274_v62 = vpack.c.bf16 %v975_v58, %v971_v56  ;;  %v3434_v63 = vpack.c.bf16 %v1168_v59, %v1164_v57 }
 0x1cf   : > { %3513 = vst [vmem:[%s4480_s17 + $0x38] sm:$0xff] %v3194_v60   ;;  %3544 = vst [vmem:[%s4484_s28 + $0x38] sm:$0xff] %v3354_v61  }
 0x1d0   : > { %3529 = vst [vmem:[%s4480_s17 + $0xb8] sm:$0xff] %v3274_v62   ;;  %3560 = vst [vmem:[%s4484_s28 + $0xb8] sm:$0xff] %v3434_v63   ;;  %v978_v1 = vpop.f32.mrb[64].mxu1  ;;  %v1171_v2 = vpop.f32.mrb[64].mxu0 }
 0x1d1   : > { %v1172_v3 = vadd.f32 %v1171_v2, %v4417_v19  ;;  %v980_v4 = vpop.f32.mrb[65].mxu1  ;;  %v1173_v5 = vpop.f32.mrb[65].mxu0  ;;  %v979_v8 = vadd.f32 %v978_v1, %v4422_v24 }
 0x1d2   : > { %v982_v6 = vpop.f32.mrb[66].mxu1  ;;  %v1175_v7 = vpop.f32.mrb[66].mxu0  ;;  %v981_v13 = vadd.f32 %v980_v4, %v4427_v25  ;;  %v1174_v14 = vadd.f32 %v1173_v5, %v4430_v41 }
 0x1d3   : > { %v983_v9 = vadd.f32 %v982_v6, %v4422_v24  ;;  %v1176_v10 = vadd.f32 %v1175_v7, %v4417_v19  ;;  %v984_v11 = vpop.f32.mrb[67].mxu1  ;;  %v1177_v12 = vpop.f32.mrb[67].mxu0 }
 0x1d4   : > { %v985_v15 = vadd.f32 %v984_v11, %v4427_v25  ;;  %v1178_v16 = vadd.f32 %v1177_v12, %v4430_v41 }
 0x1d5   : > { %v3199_v17 = vpack.c.bf16 %v983_v9, %v979_v8  ;;  %v3359_v18 = vpack.c.bf16 %v1176_v10, %v1172_v3 }
 0x1d6   : > { %v3279_v39 = vpack.c.bf16 %v985_v15, %v981_v13  ;;  %v3439_v20 = vpack.c.bf16 %v1178_v16, %v1174_v14 }
 0x1d7   : > { %3514 = vst [vmem:[%s4480_s17 + $0x40] sm:$0xff] %v3199_v17   ;;  %3545 = vst [vmem:[%s4484_s28 + $0x40] sm:$0xff] %v3359_v18  }
 0x1d8   : > { %3530 = vst [vmem:[%s4480_s17 + $0xc0] sm:$0xff] %v3279_v39   ;;  %3561 = vst [vmem:[%s4484_s28 + $0xc0] sm:$0xff] %v3439_v20   ;;  %v988_v21 = vpop.f32.mrb[68].mxu1  ;;  %v1181_v22 = vpop.f32.mrb[68].mxu0 }
 0x1d9   : > { %v1182_v26 = vadd.f32 %v1181_v22, %v4417_v19  ;;  %v990_v27 = vpop.f32.mrb[69].mxu1  ;;  %v1183_v28 = vpop.f32.mrb[69].mxu0  ;;  %v989_v31 = vadd.f32 %v988_v21, %v4422_v24 }
 0x1da   : > { %v992_v29 = vpop.f32.mrb[70].mxu1  ;;  %v1185_v30 = vpop.f32.mrb[70].mxu0  ;;  %v991_v35 = vadd.f32 %v990_v27, %v4427_v25  ;;  %v1184_v23 = vadd.f32 %v1183_v28, %v4430_v41 }
 0x1db   : > { %v993_v32 = vadd.f32 %v992_v29, %v4422_v24  ;;  %v1186_v33 = vadd.f32 %v1185_v30, %v4417_v19  ;;  %v994_v34 = vpop.f32.mrb[71].mxu1  ;;  %v1187_v37 = vpop.f32.mrb[71].mxu0 }
 0x1dc   : > { %v995_v36 = vadd.f32 %v994_v34, %v4427_v25  ;;  %v1188_v38 = vadd.f32 %v1187_v37, %v4430_v41 }
 0x1dd   : > { %v3204_v0 = vpack.c.bf16 %v993_v32, %v989_v31  ;;  %v3364_v40 = vpack.c.bf16 %v1186_v33, %v1182_v26 }
 0x1de   : > { %v3284_v42 = vpack.c.bf16 %v995_v36, %v991_v35  ;;  %v3444_v43 = vpack.c.bf16 %v1188_v38, %v1184_v23 }
 0x1df   : > { %3515 = vst [vmem:[%s4480_s17 + $0x48] sm:$0xff] %v3204_v0   ;;  %3546 = vst [vmem:[%s4484_s28 + $0x48] sm:$0xff] %v3364_v40  }
 0x1e0   : > { %3531 = vst [vmem:[%s4480_s17 + $0xc8] sm:$0xff] %v3284_v42   ;;  %3562 = vst [vmem:[%s4484_s28 + $0xc8] sm:$0xff] %v3444_v43   ;;  %v998_v44 = vpop.f32.mrb[72].mxu1  ;;  %v1191_v45 = vpop.f32.mrb[72].mxu0 }
 0x1e1   : > { %v1192_v46 = vadd.f32 %v1191_v45, %v4417_v19  ;;  %v1000_v47 = vpop.f32.mrb[73].mxu1  ;;  %v1193_v48 = vpop.f32.mrb[73].mxu0  ;;  %v999_v51 = vadd.f32 %v998_v44, %v4422_v24 }
 0x1e2   : > { %v1002_v49 = vpop.f32.mrb[74].mxu1  ;;  %v1195_v50 = vpop.f32.mrb[74].mxu0  ;;  %v1001_v56 = vadd.f32 %v1000_v47, %v4427_v25  ;;  %v1194_v57 = vadd.f32 %v1193_v48, %v4430_v41 }
 0x1e3   : > { %v1003_v52 = vadd.f32 %v1002_v49, %v4422_v24  ;;  %v1196_v53 = vadd.f32 %v1195_v50, %v4417_v19  ;;  %v1004_v54 = vpop.f32.mrb[75].mxu1  ;;  %v1197_v55 = vpop.f32.mrb[75].mxu0 }
 0x1e4   : > { %v1005_v58 = vadd.f32 %v1004_v54, %v4427_v25  ;;  %v1198_v59 = vadd.f32 %v1197_v55, %v4430_v41 }
 0x1e5   : > { %v3209_v60 = vpack.c.bf16 %v1003_v52, %v999_v51  ;;  %v3369_v61 = vpack.c.bf16 %v1196_v53, %v1192_v46 }
 0x1e6   : > { %v3289_v62 = vpack.c.bf16 %v1005_v58, %v1001_v56  ;;  %v3449_v63 = vpack.c.bf16 %v1198_v59, %v1194_v57 }
 0x1e7   : > { %3516 = vst [vmem:[%s4480_s17 + $0x50] sm:$0xff] %v3209_v60   ;;  %3547 = vst [vmem:[%s4484_s28 + $0x50] sm:$0xff] %v3369_v61  }
 0x1e8   : > { %3532 = vst [vmem:[%s4480_s17 + $0xd0] sm:$0xff] %v3289_v62   ;;  %3563 = vst [vmem:[%s4484_s28 + $0xd0] sm:$0xff] %v3449_v63   ;;  %v1008_v1 = vpop.f32.mrb[76].mxu1  ;;  %v1201_v2 = vpop.f32.mrb[76].mxu0 }
 0x1e9   : > { %v1202_v3 = vadd.f32 %v1201_v2, %v4417_v19  ;;  %v1010_v4 = vpop.f32.mrb[77].mxu1  ;;  %v1203_v5 = vpop.f32.mrb[77].mxu0  ;;  %v1009_v8 = vadd.f32 %v1008_v1, %v4422_v24 }
 0x1ea   : > { %v1012_v6 = vpop.f32.mrb[78].mxu1  ;;  %v1205_v7 = vpop.f32.mrb[78].mxu0  ;;  %v1011_v13 = vadd.f32 %v1010_v4, %v4427_v25  ;;  %v1204_v14 = vadd.f32 %v1203_v5, %v4430_v41 }
 0x1eb   : > { %v1013_v9 = vadd.f32 %v1012_v6, %v4422_v24  ;;  %v1206_v10 = vadd.f32 %v1205_v7, %v4417_v19  ;;  %v1014_v11 = vpop.f32.mrb[79].mxu1  ;;  %v1207_v12 = vpop.f32.mrb[79].mxu0 }
 0x1ec   : > { %v1015_v15 = vadd.f32 %v1014_v11, %v4427_v25  ;;  %v1208_v16 = vadd.f32 %v1207_v12, %v4430_v41 }
 0x1ed   : > { %v3214_v17 = vpack.c.bf16 %v1013_v9, %v1009_v8  ;;  %v3374_v18 = vpack.c.bf16 %v1206_v10, %v1202_v3 }
 0x1ee   : > { %v3294_v39 = vpack.c.bf16 %v1015_v15, %v1011_v13  ;;  %v3454_v20 = vpack.c.bf16 %v1208_v16, %v1204_v14 }
 0x1ef   : > { %3517 = vst [vmem:[%s4480_s17 + $0x58] sm:$0xff] %v3214_v17   ;;  %3548 = vst [vmem:[%s4484_s28 + $0x58] sm:$0xff] %v3374_v18  }
 0x1f0   : > { %3533 = vst [vmem:[%s4480_s17 + $0xd8] sm:$0xff] %v3294_v39   ;;  %3564 = vst [vmem:[%s4484_s28 + $0xd8] sm:$0xff] %v3454_v20   ;;  %v1018_v21 = vpop.f32.mrb[80].mxu1  ;;  %v1211_v22 = vpop.f32.mrb[80].mxu0 }
 0x1f1   : > { %v1212_v26 = vadd.f32 %v1211_v22, %v4417_v19  ;;  %v1020_v27 = vpop.f32.mrb[81].mxu1  ;;  %v1213_v28 = vpop.f32.mrb[81].mxu0  ;;  %v1019_v31 = vadd.f32 %v1018_v21, %v4422_v24 }
 0x1f2   : > { %v1022_v29 = vpop.f32.mrb[82].mxu1  ;;  %v1215_v30 = vpop.f32.mrb[82].mxu0  ;;  %v1021_v35 = vadd.f32 %v1020_v27, %v4427_v25  ;;  %v1214_v23 = vadd.f32 %v1213_v28, %v4430_v41 }
 0x1f3   : > { %v1023_v32 = vadd.f32 %v1022_v29, %v4422_v24  ;;  %v1216_v33 = vadd.f32 %v1215_v30, %v4417_v19  ;;  %v1024_v34 = vpop.f32.mrb[83].mxu1  ;;  %v1217_v37 = vpop.f32.mrb[83].mxu0 }
 0x1f4   : > { %v1025_v36 = vadd.f32 %v1024_v34, %v4427_v25  ;;  %v1218_v38 = vadd.f32 %v1217_v37, %v4430_v41 }
 0x1f5   : > { %v3219_v0 = vpack.c.bf16 %v1023_v32, %v1019_v31  ;;  %v3379_v40 = vpack.c.bf16 %v1216_v33, %v1212_v26 }
 0x1f6   : > { %v3299_v42 = vpack.c.bf16 %v1025_v36, %v1021_v35  ;;  %v3459_v43 = vpack.c.bf16 %v1218_v38, %v1214_v23 }
 0x1f7   : > { %3518 = vst [vmem:[%s4480_s17 + $0x60] sm:$0xff] %v3219_v0   ;;  %3549 = vst [vmem:[%s4484_s28 + $0x60] sm:$0xff] %v3379_v40  }
 0x1f8   : > { %3534 = vst [vmem:[%s4480_s17 + $0xe0] sm:$0xff] %v3299_v42   ;;  %3565 = vst [vmem:[%s4484_s28 + $0xe0] sm:$0xff] %v3459_v43   ;;  %v1028_v44 = vpop.f32.mrb[84].mxu1  ;;  %v1221_v45 = vpop.f32.mrb[84].mxu0 }
 0x1f9   : > { %v1222_v46 = vadd.f32 %v1221_v45, %v4417_v19  ;;  %v1030_v47 = vpop.f32.mrb[85].mxu1  ;;  %v1223_v48 = vpop.f32.mrb[85].mxu0  ;;  %v1029_v51 = vadd.f32 %v1028_v44, %v4422_v24 }
 0x1fa   : > { %v1032_v49 = vpop.f32.mrb[86].mxu1  ;;  %v1225_v50 = vpop.f32.mrb[86].mxu0  ;;  %v1031_v56 = vadd.f32 %v1030_v47, %v4427_v25  ;;  %v1224_v57 = vadd.f32 %v1223_v48, %v4430_v41 }
 0x1fb   : > { %v1033_v52 = vadd.f32 %v1032_v49, %v4422_v24  ;;  %v1226_v53 = vadd.f32 %v1225_v50, %v4417_v19  ;;  %v1034_v54 = vpop.f32.mrb[87].mxu1  ;;  %v1227_v55 = vpop.f32.mrb[87].mxu0 }
 0x1fc   : > { %v1035_v58 = vadd.f32 %v1034_v54, %v4427_v25  ;;  %v1228_v59 = vadd.f32 %v1227_v55, %v4430_v41 }
 0x1fd   : > { %v3224_v60 = vpack.c.bf16 %v1033_v52, %v1029_v51  ;;  %v3384_v61 = vpack.c.bf16 %v1226_v53, %v1222_v46 }
 0x1fe   : > { %v3304_v62 = vpack.c.bf16 %v1035_v58, %v1031_v56  ;;  %v3464_v63 = vpack.c.bf16 %v1228_v59, %v1224_v57 }
 0x1ff   : > { %3519 = vst [vmem:[%s4480_s17 + $0x68] sm:$0xff] %v3224_v60   ;;  %3550 = vst [vmem:[%s4484_s28 + $0x68] sm:$0xff] %v3384_v61  }
 0x200   : > { %3535 = vst [vmem:[%s4480_s17 + $0xe8] sm:$0xff] %v3304_v62   ;;  %3566 = vst [vmem:[%s4484_s28 + $0xe8] sm:$0xff] %v3464_v63   ;;  %v1038_v1 = vpop.f32.mrb[88].mxu1  ;;  %v1231_v2 = vpop.f32.mrb[88].mxu0 }
 0x201   : > { %v1232_v3 = vadd.f32 %v1231_v2, %v4417_v19  ;;  %v1040_v4 = vpop.f32.mrb[89].mxu1  ;;  %v1233_v5 = vpop.f32.mrb[89].mxu0  ;;  %v1039_v8 = vadd.f32 %v1038_v1, %v4422_v24 }
 0x202   : > { %v1042_v6 = vpop.f32.mrb[90].mxu1  ;;  %v1235_v7 = vpop.f32.mrb[90].mxu0  ;;  %v1041_v13 = vadd.f32 %v1040_v4, %v4427_v25  ;;  %v1234_v14 = vadd.f32 %v1233_v5, %v4430_v41 }
 0x203   : > { %v1043_v9 = vadd.f32 %v1042_v6, %v4422_v24  ;;  %v1236_v10 = vadd.f32 %v1235_v7, %v4417_v19  ;;  %v1044_v11 = vpop.f32.mrb[91].mxu1  ;;  %v1237_v12 = vpop.f32.mrb[91].mxu0 }
 0x204   : > { %v1045_v15 = vadd.f32 %v1044_v11, %v4427_v25  ;;  %v1238_v16 = vadd.f32 %v1237_v12, %v4430_v41 }
 0x205   : > { %v3229_v17 = vpack.c.bf16 %v1043_v9, %v1039_v8  ;;  %v3389_v18 = vpack.c.bf16 %v1236_v10, %v1232_v3 }
 0x206   : > { %v3309_v39 = vpack.c.bf16 %v1045_v15, %v1041_v13  ;;  %v3469_v20 = vpack.c.bf16 %v1238_v16, %v1234_v14 }
 0x207   : > { %3520 = vst [vmem:[%s4480_s17 + $0x70] sm:$0xff] %v3229_v17   ;;  %3551 = vst [vmem:[%s4484_s28 + $0x70] sm:$0xff] %v3389_v18  }
 0x208   : > { %3536 = vst [vmem:[%s4480_s17 + $0xf0] sm:$0xff] %v3309_v39   ;;  %3567 = vst [vmem:[%s4484_s28 + $0xf0] sm:$0xff] %v3469_v20   ;;  %v1048_v21 = vpop.f32.mrb[92].mxu1  ;;  %v1241_v22 = vpop.f32.mrb[92].mxu0 }
 0x209   : > { %v1242_v26 = vadd.f32 %v1241_v22, %v4417_v19  ;;  %v1050_v27 = vpop.f32.mrb[93].mxu1  ;;  %v1243_v28 = vpop.f32.mrb[93].mxu0  ;;  %v1049_v31 = vadd.f32 %v1048_v21, %v4422_v24 }
 0x20a   : > { %v1052_v29 = vpop.f32.mrb[94].mxu1  ;;  %v1245_v30 = vpop.f32.mrb[94].mxu0  ;;  %v1051_v35 = vadd.f32 %v1050_v27, %v4427_v25  ;;  %v1244_v23 = vadd.f32 %v1243_v28, %v4430_v41 }
 0x20b   : > { %v1053_v32 = vadd.f32 %v1052_v29, %v4422_v24  ;;  %v1246_v33 = vadd.f32 %v1245_v30, %v4417_v19  ;;  %v1054_v34 = vpop.f32.mrb[95].mxu1  ;;  %v1247_v37 = vpop.f32.mrb[95].mxu0 }
 0x20c   : > { %v1055_v36 = vadd.f32 %v1054_v34, %v4427_v25  ;;  %v1248_v38 = vadd.f32 %v1247_v37, %v4430_v41 }
 0x20d   : > { %v3234_v24 = vpack.c.bf16 %v1053_v32, %v1049_v31  ;;  %v3394_v0 = vpack.c.bf16 %v1246_v33, %v1242_v26 }
 0x20e   : > { %v3314_v19 = vpack.c.bf16 %v1055_v36, %v1051_v35  ;;  %v3474_v40 = vpack.c.bf16 %v1248_v38, %v1244_v23 }
 0x20f   : > { %3521 = vst [vmem:[%s4480_s17 + $0x78] sm:$0xff] %v3234_v24   ;;  %3552 = vst [vmem:[%s4484_s28 + $0x78] sm:$0xff] %v3394_v0  }
 0x210   : > { %3537 = vst [vmem:[%s4480_s17 + $0xf8] sm:$0xff] %v3314_v19   ;;  %3568 = vst [vmem:[%s4484_s28 + $0xf8] sm:$0xff] %v3474_v40  }
 0x211   : > { %3846 = shalt.err (!%p3843_p3)
}
 0x212   : > { %s3847_s8 = scalar_lea.hbm %s4672_s15, 4096  ;;  %s3851_s29 = scalar_lea.hbm %s4769_s4, 8192 }
 0x213   : > { %p3848_p7 = scmp.ne.s32.totalorder %s4672_s15, %s3847_s8  ;;  %p3852_p6 = scmp.lt.u32.totalorder %s4672_s15, %s4769_s4 }
 0x214   : > { %p3853_p8 = scmp.lt.u32.totalorder %s3851_s29, %s3847_s8  ;;  %p3855_p11 = scmp.lt.u32.totalorder %s3847_s8, %s4672_s15 }
 0x215   : > { %p3849_p13 = pnand %p3848_p7, %p4089_p10 }
 0x216   : > { %p3854_p12 = por %p3853_p8, %p3852_p6 }
 0x217   : > { %p3850_p4 = pneg %p3849_p13 }
 0x218   : > { %p3856_p0 = por %p3855_p11, %p3854_p12 }
 0x21a   : > { %p3857_p5 = pnand %p3856_p0, %p3850_p4 }
 0x21c   : > { %3860 = shalt.err (!%p3857_p5)
}
 0x21d   : > { %s4789_s10 = smov 64   ;;  %s3861_s6 = scalar_lea.vmem %s4684_s24, 4096 }
 0x21e   : > { %3592 = dma.vmem_to_hbm [thread:$0]  (%p4089_p10), %s4674_s30, 4096, %s4672_s15, %s4688_s14, %s4789_s10, %s4789_s10, %s3962_s26  }
 0x21f   : > { %p3862_p9 = scmp.ne.s32.totalorder %s4684_s24, %s3861_s6  ;;  %s3964_s9 = smov [#allocation10]  }
 0x220   : > { %s3865_s16 = sshll.u32 %s3964_s9, 4  ;;  %s3866_s16 = int_to_ptr.vmem [resolvable:$false] %s3865_s16 }
 0x221   : > { %p3863_p1 = pnand %p3862_p9, %p4089_p10  ;;  %s3867_s8 = scalar_lea.vmem %s3866_s16, 8192 }
 0x222   : > { %p3868_p3 = scmp.lt.s32.totalorder %s4684_s24, %s3866_s16  ;;  %p3869_p7 = scmp.lt.s32.totalorder %s3867_s8, %s3861_s6 }
 0x223   : > { %p3864_p2 = pneg %p3863_p1 }
 0x224   : > { %p3870_p13 = por %p3869_p7, %p3868_p3 }
 0x226   : > { %p3871_p4 = pnand %p3870_p13, %p3864_p2 }
 0x228   : > { %3874 = shalt.err (!%p3871_p4)
}
 0x229   : > { %s3875_s30 = scalar_lea.hbm %s4682_s12, 4096  ;;  %s3879_s28 = scalar_lea.hbm %s4770_s5, 8192 }
 0x22a   : > { %p3876_p6 = scmp.ne.s32.totalorder %s4682_s12, %s3875_s30  ;;  %p3880_p11 = scmp.lt.u32.totalorder %s4682_s12, %s4770_s5 }
 0x22b   : > { %p3881_p0 = scmp.lt.u32.totalorder %s3879_s28, %s3875_s30  ;;  %p3883_p9 = scmp.lt.u32.totalorder %s3875_s30, %s4682_s12 }
 0x22c   : > { %p3877_p8 = pnand %p3876_p6, %p4089_p10 }
 0x22d   : > { %p3882_p5 = por %p3881_p0, %p3880_p11 }
 0x22e   : > { %p3878_p12 = pneg %p3877_p8 }
 0x22f   : > { %p3884_p1 = por %p3883_p9, %p3882_p5 }
 0x231   : > { %p3885_p2 = pnand %p3884_p1, %p3878_p12 }
 0x233   : > { %3888 = shalt.err (!%p3885_p2)
}
 0x234   : > { %3593 = dma.vmem_to_hbm [thread:$0]  (%p4089_p10), %s4684_s24, 4096, %s4682_s12, %s4688_s14, %s4789_s10, %s4789_s10, %s3962_s26  }
 0x235 PF: > { %s2290_s25 = sand.u32 1, %s3931_s18   ;;  %p4790_p3 = scmp.ne.s32.totalorder %s4778_s27, 0 }
 0x236   : > { %p4791_p7 = scmp.ge.s32.totalorder %s3951_s23, 2  ;;  %s2291_s6 = scalar_lea.sflag [#allocation4], %s2290_s25 }
 0x238   : > { %p3606_p13 = pnand %p4791_p7, %p4790_p3 }
 0x23a   : > { %3922 = dma.done.wait (!%p3606_p13), %s2291_s6, 4096  }
 0x23b   : > { %3924 = vsyncadd (!%p3606_p13), %s2291_s6, 4294963200  ;;  %s4792_s11 = sadd.s32 4294967294, %s3951_s23  }
 0x23c   : > { %s2299_s9 = sand.u32 1, %s4792_s11  }
 0x23d   : > { %s2300_s16 = scalar_lea.sflag [#allocation9], %s2299_s9 }
 0x23e   : > { %3926 = dma.done.wait (!%p3606_p13), %s2300_s16, 8192  }
 0x23f   : > { %3928 = vsyncadd (!%p3606_p13), %s2300_s16, 4294959104  ;;  %s26_s23 = sadd.s32 1, %s3951_s23   ;;  %s4793_s18 = smov %s3935_s19 }
 0x240   : > { %p23_p10 = scmp.ge.s32.totalorder %s26_s23, 4   ;;  %s4794_s19 = smov %s3939_s20 }
 0x241   : > { %s4795_s20 = smov %s4098_s13  ;;  %s4796_s21 = smov %s3947_s22 }
 0x242   : > { %s4797_s22 = smov %s4799_s7  ;;  %25 = sbr.rel (!%p23_p10) target bundleno = 9 (0x9), region = 116 }
 0x249   :  { %2314 = vsyncpa [#allocation3], 1 }
 0x24a   :  { %2316 = vsyncpa [#allocation3 + $0x1], 1 }
 0x24b   :  { %2317 = vsyncpa [#allocation6], 1 }
 0x24c   :  { %2318 = vsyncpa [#allocation4], 1 }
 0x24d   :  { %2320 = vsyncpa [#allocation4 + $0x1], 1 }
 0x24e   :  { %2321 = vsyncpa [#allocation9], 1 }
 0x24f   :  { %2323 = vsyncpa [#allocation9 + $0x1], 1 }

</bundles_post_ra>
